<compile_context>
chip_gen: v6e
topology: v6e:2x2x1
jax: 0.10.0
libtpu: 0.0.40
codegen_flags: <defaults>
</compile_context>

<pallas_src>
import math

import jax
import jax.numpy as jnp
import numpy as np
from jax import lax
from jax.experimental import pallas as pl
from jax.experimental.pallas import tpu as pltpu

GROUP = 8                 # timesteps per unrolled scan group (= sublane width)
OUTER_UNROLL = 2          # unroll of the group loop; tune per di (review #10)
EXP_DTYPE = jnp.float32   # set jnp.bfloat16 on v6e/v7x to halve EUP pushes in the
                          # scan (review #10); keep f32 on v5e (no bf16 EUP).


# ----------------------------------------------------------------------------
# Pallas kernel: one (batch, sequence-chunk) tile per grid step.
# ----------------------------------------------------------------------------
def _mamba_kernel(x_ref, win_ref, convw_ref, convb_ref, wx_ref, wdt_ref,
                  bdt_ref, a_ref, dparam_ref, wout_ref,
                  out_ref,
                  state_s, xtail_s, delta_s, du_s, bc_s, y_s):
    C, _ = x_ref.shape                  # chunk length, model dim
    n, di = a_ref.shape                 # state dim (sublanes), inner dim (lanes)
    dconv = convw_ref.shape[0]
    dt_rank = wdt_ref.shape[0]
    f32 = jnp.float32

    ci = pl.program_id(1)               # chunk index within the sequence

    # ---- reset carried scratch at the start of every sequence ----------------
    @pl.when(ci == 0)
    def _():
        state_s[...] = jnp.zeros_like(state_s)
        xtail_s[...] = jnp.zeros_like(xtail_s)

    # ---- in_proj: (C, d) @ (d, 2*di) -> conv input and gate ------------------
    # NOTE (review #11): at production sizes require di % 128 == 0 so this split
    # and the gate slice stay lane-tile aligned.
    x_bf = x_ref[...].astype(jnp.bfloat16)
    x_and_res = jnp.dot(x_bf, win_ref[...], preferred_element_type=f32)
    xi = x_and_res[:, :di]              # (C, di)
    res = x_and_res[:, di:]             # (C, di)

    # ---- causal depthwise conv1d; cross-chunk tail carried as (8, di) --------
    rowC = lax.broadcasted_iota(jnp.int32, (C, di), 0)
    conv = jnp.zeros((C, di), f32) + convb_ref[...]
    for k in range(dconv):              # static unroll (dconv is tiny)
        s = dconv - 1 - k
        w_k = convw_ref[k:k + 1, :]     # (1, di)
        if s == 0:
            conv = conv + w_k * xi
        else:
            cur = pltpu.roll(xi, shift=s, axis=0)      # cur[t] = xi[t-s] (wrap)
            conv = conv + w_k * jnp.where(rowC >= s, cur, 0.0)

    if dconv > 1:
        # head correction for the first dconv-1 rows from the previous chunk's
        # tail (xtail_s rows 8-(dconv-1) .. 7 hold prev_xi[C-(dconv-1) .. C-1]).
        row8 = lax.broadcasted_iota(jnp.int32, (8, di), 0)
        tail = xtail_s[...]
        head = jnp.zeros((8, di), f32)
        for k in range(dconv - 1):
            s = dconv - 1 - k
            w_k = convw_ref[k:k + 1, :]
            head = head + w_k * jnp.where(
                row8 < s, pltpu.roll(tail, shift=s, axis=0), 0.0)
        # add the head to the first 8 rows via a scratch round-trip (delta_s is
        # free at this point and is fully overwritten with delta below).
        delta_s[...] = conv
        delta_s[pl.ds(0, 8), :] = delta_s[pl.ds(0, 8), :] + head
        conv = delta_s[...]
        # carry this chunk's tail for the next chunk
        xtail_s[pl.ds(8 - (dconv - 1), dconv - 1), :] = xi[C - (dconv - 1):, :]

    u = conv * jax.nn.sigmoid(conv)     # SiLU -> SSM input `u`, (C, di)

    # ---- x_proj (single thin matmul, review #1) + dt_proj --------------------
    u_bf = u.astype(jnp.bfloat16)
    x_dbl = jnp.dot(u_bf, wx_ref[...], preferred_element_type=f32)  # (C, dt_rank+2n)
    delta = jax.nn.softplus(
        jnp.dot(x_dbl[:, :dt_rank], wdt_ref[...], preferred_element_type=f32)
        + bdt_ref[...])                                             # (C, di)
    delta_s[...] = delta
    du_s[...] = delta * u
    bc_s[...] = x_dbl[:, dt_rank:]                                  # (C, 2n)

    # ---- selective scan: state (n, di), carried across chunks ----------------
    A = a_ref[...]                      # (n, di) = -exp(A_log).T

    def group_body(g, st):
        base = pl.multiple_of(g * GROUP, GROUP)
        d_blk = delta_s[pl.ds(base, GROUP), :]          # (8, di)
        du_blk = du_s[pl.ds(base, GROUP), :]            # (8, di)
        bcT = bc_s[pl.ds(base, GROUP), :].T             # (2n, 8)  tiny transpose
        rows = []
        for j in range(GROUP):                          # static unroll
            dlt = d_blk[j:j + 1, :]                     # (1, di)
            dA = jnp.exp((dlt * A).astype(EXP_DTYPE)).astype(f32)   # (n, di) EUP
            st = dA * st + du_blk[j:j + 1, :] * bcT[0:n, j:j + 1]
            rows.append(jnp.sum(st * bcT[n:2 * n, j:j + 1], axis=0,
                                keepdims=True))         # (1, di)
        y_s[pl.ds(base, GROUP), :] = jnp.concatenate(rows, axis=0)
        return st

    n_groups = C // GROUP
    st_final = lax.fori_loop(0, n_groups, group_body, state_s[...],
                             unroll=max(1, min(OUTER_UNROLL, n_groups)))
    state_s[...] = st_final                              # carry to next chunk

    # ---- skip connection, gate, out_proj --------------------------------------
    y = y_s[...] + u * dparam_ref[...]
    y = y * (res * jax.nn.sigmoid(res))
    out_ref[...] = jnp.dot(y.astype(jnp.bfloat16), wout_ref[...],
                           preferred_element_type=f32).astype(out_ref.dtype)


# ----------------------------------------------------------------------------
# Helpers: single-buffered weights (review #2) and VMEM budget (review #3)
# ----------------------------------------------------------------------------
_WEIGHT_PIPE_MODE_CACHE = []


def _weight_pipeline_mode():
    """Probe whether pl.Buffered(1) (single-buffered constant blocks) works."""
    if _WEIGHT_PIPE_MODE_CACHE:
        return _WEIGHT_PIPE_MODE_CACHE[0]
    mode = None
    try:
        buffered1 = pl.Buffered(1)

        def probe_kernel(w_ref, x_ref, o_ref):
            o_ref[...] = x_ref[...] + w_ref[...]

        xp = jnp.arange(16 * 128, dtype=jnp.float32).reshape(16, 128)
        wp = jnp.ones((8, 128), jnp.float32)
        outp = pl.pallas_call(
            probe_kernel,
            out_shape=jax.ShapeDtypeStruct((16, 128), jnp.float32),
            grid=(2,),
            in_specs=[pl.BlockSpec((8, 128), lambda i: (0, 0),
                                   pipeline_mode=buffered1),
                      pl.BlockSpec((8, 128), lambda i: (i, 0))],
            out_specs=pl.BlockSpec((8, 128), lambda i: (i, 0)),
        )(wp, xp)
        outp = np.asarray(jax.block_until_ready(outp))
        if np.allclose(outp, np.asarray(xp) + 1.0):
            mode = buffered1
    except Exception:
        mode = None
    _WEIGHT_PIPE_MODE_CACHE.append(mode)
    return mode


def _vmem_limit_bytes():
    """Generation-aware VMEM request: ~100 MiB on v5e/v6e, ~85% of VMEM on v7x."""
    default = 64 * 1024 * 1024
    try:
        info = pltpu.get_tpu_info()
        cap = getattr(info, "vmem_capacity_bytes", None)
        if not cap:
            return default
        return int(min(100 * 1024 * 1024, int(cap * 0.85)))
    except Exception:
        return default


# ----------------------------------------------------------------------------
# Wrapper
# ----------------------------------------------------------------------------
def mamba_pallas(x, params, *, chunk=None):
    Win, convw, convb, Wx, Wdt, bdt, Alog, Dp, Wout = params
    b, l, d = x.shape
    di, n = Alog.shape
    dconv = convw.shape[0]
    dt_rank = Wdt.shape[0]

    # Chunk guidance (reviews #7/#8): multiples of 256 (>=512 if VMEM allows) on
    # v6e, cap ~256 on v7x, multiples of 128 on v5e; must be a multiple of 8.
    C = l if chunk is None else chunk
    assert l % C == 0, "sequence length must be a multiple of the chunk size"
    assert C % GROUP == 0 and C >= 8, "chunk must be a multiple of 8 (>= 8)"
    n_chunks = l // C

    f32, bf16 = jnp.float32, jnp.bfloat16
    # Mathematically-identical weight re-layout: A = -exp(A_log) transposed to
    # (n, di) so di sits on lanes.  No Wdelta fusion (review #1).
    A_nd = (-jnp.exp(Alog.astype(f32))).T                 # (n, di)
    Win_b = Win.astype(bf16)
    Wx_b = Wx.astype(bf16)
    Wout_b = Wout.astype(bf16)
    Wdt_f = Wdt.astype(f32)                               # thin; keep f32

    wmode = _weight_pipeline_mode()

    def wspec(shape):
        # full-array block, resident in VMEM; single-buffered when supported.
        idx = lambda bi, ci: (0,) * len(shape)
        if wmode is not None:
            return pl.BlockSpec(shape, idx, pipeline_mode=wmode)
        return pl.BlockSpec(shape, idx)

    grid_spec = pltpu.PrefetchScalarGridSpec(
        num_scalar_prefetch=0,
        grid=(b, n_chunks),
        in_specs=[
            pl.BlockSpec((None, C, d), lambda bi, ci: (bi, ci, 0)),   # x
            wspec(Win_b.shape),
            wspec(convw.shape),
            wspec(convb.shape),
            wspec(Wx_b.shape),
            wspec(Wdt_f.shape),
            wspec(bdt.shape),
            wspec(A_nd.shape),
            wspec(Dp.shape),
            wspec(Wout_b.shape),
        ],
        out_specs=pl.BlockSpec((None, C, d), lambda bi, ci: (bi, ci, 0)),
        scratch_shapes=[
            pltpu.VMEM((n, di), f32),       # SSM state, carried across chunks
            pltpu.VMEM((8, di), f32),       # conv tail (last dconv-1 rows), carried
            pltpu.VMEM((C, di), f32),       # delta (also conv round-trip buffer)
            pltpu.VMEM((C, di), f32),       # delta * u
            pltpu.VMEM((C, 2 * n), f32),    # B and C rows (lane-dense, review #5)
            pltpu.VMEM((C, di), f32),       # y (scan output)
        ],
    )

    # cost estimate updated for the un-fused projections (review #1)
    flops = int(2 * b * l * (d * 2 * di + di * (dt_rank + 2 * n)
                             + dt_rank * di + di * d)
                + b * l * di * (7 * n + 2 * dconv + 10))
    transcendentals = int(b * l * di * (n + 4))
    bytes_accessed = int(
        2 * b * l * d * 4
        + 2 * (Win_b.size + Wx_b.size + Wout_b.size)
        + 4 * (convw.size + convb.size + Wdt_f.size + bdt.size
               + A_nd.size + Dp.size))

    return pl.pallas_call(
        _mamba_kernel,
        out_shape=jax.ShapeDtypeStruct((b, l, d), jnp.float32),
        grid_spec=grid_spec,
        compiler_params=pltpu.CompilerParams(
            dimension_semantics=("parallel", "arbitrary"),
            vmem_limit_bytes=_vmem_limit_bytes()),
        cost_estimate=pl.CostEstimate(flops=flops,
                                      transcendentals=transcendentals,
                                      bytes_accessed=bytes_accessed),
    )(x, Win_b, convw, convb, Wx_b, Wdt_f, bdt, A_nd, Dp, Wout_b)


# ----------------------------------------------------------------------------
# Pure-JAX reference (mirrors the PyTorch forward exactly, f32 throughout)
# ----------------------------------------------------------------------------
def mamba_ref(x, params):
    Win, convw, convb, Wx, Wdt, bdt, Alog, Dp, Wout = params
    b, l, d = x.shape
    di, n = Alog.shape
    dconv = convw.shape[0]
    dt_rank = Wdt.shape[0]

    x_and_res = x @ Win                          # (b, l, 2*di)
    xi, res = x_and_res[..., :di], x_and_res[..., di:]

    xpad = jnp.pad(xi, ((0, 0), (dconv - 1, 0), (0, 0)))
    conv = jnp.zeros_like(xi) + convb
    for k in range(dconv):
        conv = conv + convw[k] * xpad[:, k:k + l, :]
    u = jax.nn.silu(conv)                        # (b, l, di)

    x_dbl = u @ Wx
    delta = jax.nn.softplus(x_dbl[..., :dt_rank] @ Wdt + bdt)   # (b, l, di)
    Bm = x_dbl[..., dt_rank:dt_rank + n]
    Cm = x_dbl[..., dt_rank + n:dt_rank + 2 * n]

    A = -jnp.exp(Alog)
    dA = jnp.exp(delta[..., None] * A)                           # (b, l, di, n)
    dBu = (delta * u)[..., None] * Bm[:, :, None, :]             # (b, l, di, n)

    def scan_fn(st, inp):
        dA_t, dBu_t, C_t = inp
        st = dA_t * st + dBu_t
        y_t = jnp.sum(st * C_t[:, None, :], axis=-1)
        return st, y_t

    st0 = jnp.zeros((b, di, n), jnp.float32)
    _, ys = lax.scan(scan_fn, st0,
                     (dA.transpose(1, 0, 2, 3),
                      dBu.transpose(1, 0, 2, 3),
                      Cm.transpose(1, 0, 2)))
    y = ys.transpose(1, 0, 2)                    # (b, l, di)
    y = y + u * Dp
    y = y * jax.nn.silu(res)
    return y @ Wout


# ----------------------------------------------------------------------------
# Main
# ----------------------------------------------------------------------------
if __name__ == "__main__":
    # small shapes consistent with the module; l=16 with chunk=8 exercises the
    # cross-chunk SSM-state and conv-tail carries.
    b, l, dim = 2, 16, 32
    d_state, d_conv, expand = 16, 4, 2
    di = dim * expand
    dt_rank = math.ceil(dim / 16)

    key = jax.random.PRNGKey(0)
    ks = jax.random.split(key, 8)
    Win = jax.random.normal(ks[0], (dim, 2 * di), jnp.float32) * 0.1
    convw = jax.random.normal(ks[1], (d_conv, di), jnp.float32) * 0.3
    convb = jax.random.normal(ks[2], (1, di), jnp.float32) * 0.1
    Wx = jax.random.normal(ks[3], (di, dt_rank + 2 * d_state), jnp.float32) * 0.1
    Wdt = jax.random.normal(ks[4], (dt_rank, di), jnp.float32) * 0.3
    bdt = jax.random.normal(ks[5], (1, di), jnp.float32) * 0.1
    Alog = jnp.log(jnp.broadcast_to(
        jnp.arange(1, d_state + 1, dtype=jnp.float32), (di, d_state)))
    Dp = jnp.ones((1, di), jnp.float32)
    Wout = jax.random.normal(ks[6], (di, dim), jnp.float32) * 0.1
    params = (Win, convw, convb, Wx, Wdt, bdt, Alog, Dp, Wout)

    x = jax.random.normal(ks[7], (b, l, dim), jnp.float32)

    out = mamba_pallas(x, params, chunk=8)
    out = jax.block_until_ready(out)

    ref = jax.block_until_ready(mamba_ref(x, params))
    np.testing.assert_allclose(np.asarray(out), np.asarray(ref),
                               rtol=2e-2, atol=2e-2)

    print("KERNEL_OK")
</pallas_src>

<mosaic_0001>
module attributes {stable_mosaic.version = 11 : i64} {
  func.func @probe_kernel(%arg0: i32, %arg1: memref<8x128xf32, #tpu.memory_space<vmem>>, %arg2: memref<8x128xf32, #tpu.memory_space<vmem>>, %arg3: memref<8x128xf32, #tpu.memory_space<vmem>>) attributes {dimension_semantics = [#tpu.dimension_semantics<arbitrary>], iteration_bounds = array<i64: 2>, scalar_prefetch = 0 : i64, scratch_operands = 0 : i64, tpu.core_type = #tpu.core_type<tc>, window_params = [{pipeline_mode = #tpu.pipeline_mode<synchronous>, transform_indices = @transform_0, window_bounds = array<i64: 8, 128>}, {transform_indices = @transform_1, window_bounds = array<i64: 8, 128>}, {transform_indices = @transform_2, window_bounds = array<i64: 8, 128>}]} {
    %c0 = arith.constant 0 : index
    %c0_0 = arith.constant 0 : index
    %0 = vector.load %arg2[%c0, %c0_0] : memref<8x128xf32, #tpu.memory_space<vmem>>, vector<8x128xf32>
    %c0_1 = arith.constant 0 : index
    %c0_2 = arith.constant 0 : index
    %1 = vector.load %arg1[%c0_1, %c0_2] : memref<8x128xf32, #tpu.memory_space<vmem>>, vector<8x128xf32>
    %2 = arith.addf %0, %1 : vector<8x128xf32>
    %c0_3 = arith.constant 0 : index
    %c0_4 = arith.constant 0 : index
    %3 = vector.load %arg3[%c0_3, %c0_4] : memref<8x128xf32, #tpu.memory_space<vmem>>, vector<8x128xf32>
    tpu.vector_store %arg3[%c0_3, %c0_4], %2 {strides = array<i32>} : memref<8x128xf32, #tpu.memory_space<vmem>>, vector<8x128xf32>,
    return
  }
  func.func @transform_0(%arg0: i32) -> (i32, i32) {
    %c0_i32 = arith.constant 0 : i32
    %c0_i32_0 = arith.constant 0 : i32
    %c0_i32_1 = arith.constant 0 : i32
    return %c0_i32, %c0_i32_0 : i32, i32
  }
  func.func @transform_1(%arg0: i32) -> (i32, i32) {
    %c0_i32 = arith.constant 0 : i32
    %c0_i32_0 = arith.constant 0 : i32
    return %arg0, %c0_i32 : i32, i32
  }
  func.func @transform_2(%arg0: i32) -> (i32, i32) {
    %c0_i32 = arith.constant 0 : i32
    %c0_i32_0 = arith.constant 0 : i32
    return %arg0, %c0_i32 : i32, i32
  }
}

module attributes {stable_mosaic.version = 11 : i64} {
  func.func @_mamba_kernel(%arg0: i32, %arg1: i32, %arg2: memref<1x8x32xf32, #tpu.memory_space<vmem>>, %arg3: memref<32x128xbf16, #tpu.memory_space<vmem>>, %arg4: memref<4x64xf32, #tpu.memory_space<vmem>>, %arg5: memref<1x64xf32, #tpu.memory_space<vmem>>, %arg6: memref<64x34xbf16, #tpu.memory_space<vmem>>, %arg7: memref<2x64xf32, #tpu.memory_space<vmem>>, %arg8: memref<1x64xf32, #tpu.memory_space<vmem>>, %arg9: memref<16x64xf32, #tpu.memory_space<vmem>>, %arg10: memref<1x64xf32, #tpu.memory_space<vmem>>, %arg11: memref<64x32xbf16, #tpu.memory_space<vmem>>, %arg12: memref<1x8x32xf32, #tpu.memory_space<vmem>>, %arg13: memref<16x64xf32, #tpu.memory_space<vmem>>, %arg14: memref<8x64xf32, #tpu.memory_space<vmem>>, %arg15: memref<8x64xf32, #tpu.memory_space<vmem>>, %arg16: memref<8x64xf32, #tpu.memory_space<vmem>>, %arg17: memref<8x32xf32, #tpu.memory_space<vmem>>, %arg18: memref<8x64xf32, #tpu.memory_space<vmem>>) attributes {dimension_semantics = [#tpu.dimension_semantics<parallel>, #tpu.dimension_semantics<arbitrary>], iteration_bounds = array<i64: 2, 2>, scalar_prefetch = 0 : i64, scratch_operands = 6 : i64, tpu.core_type = #tpu.core_type<tc>, window_params = [{transform_indices = @transform_0, window_bounds = array<i64: 1, 8, 32>}, {pipeline_mode = #tpu.pipeline_mode<synchronous>, transform_indices = @transform_1, window_bounds = array<i64: 32, 128>}, {pipeline_mode = #tpu.pipeline_mode<synchronous>, transform_indices = @transform_2, window_bounds = array<i64: 4, 64>}, {pipeline_mode = #tpu.pipeline_mode<synchronous>, transform_indices = @transform_3, window_bounds = array<i64: 1, 64>}, {pipeline_mode = #tpu.pipeline_mode<synchronous>, transform_indices = @transform_4, window_bounds = array<i64: 64, 34>}, {pipeline_mode = #tpu.pipeline_mode<synchronous>, transform_indices = @transform_5, window_bounds = array<i64: 2, 64>}, {pipeline_mode = #tpu.pipeline_mode<synchronous>, transform_indices = @transform_6, window_bounds = array<i64: 1, 64>}, {pipeline_mode = #tpu.pipeline_mode<synchronous>, transform_indices = @transform_7, window_bounds = array<i64: 16, 64>}, {pipeline_mode = #tpu.pipeline_mode<synchronous>, transform_indices = @transform_8, window_bounds = array<i64: 1, 64>}, {pipeline_mode = #tpu.pipeline_mode<synchronous>, transform_indices = @transform_9, window_bounds = array<i64: 64, 32>}, {transform_indices = @transform_10, window_bounds = array<i64: 1, 8, 32>}]} {
    %c0_i32 = arith.constant 0 : i32
    %0 = arith.cmpi eq, %arg1, %c0_i32 : i32
    %1 = arith.extui %0 : i1 to i32
    %c0_i32_0 = arith.constant 0 : i32
    %2 = arith.cmpi ne, %1, %c0_i32_0 : i32
    scf.if %2 {
      %cst_94 = arith.constant 0.000000e+00 : f32
      %278 = vector.broadcast %cst_94 : f32 to vector<16x64xf32>
      %c0_95 = arith.constant 0 : index
      %c0_96 = arith.constant 0 : index
      %279 = vector.load %arg13[%c0_95, %c0_96] : memref<16x64xf32, #tpu.memory_space<vmem>>, vector<16x64xf32>
      tpu.vector_store %arg13[%c0_95, %c0_96], %278 {strides = array<i32>} : memref<16x64xf32, #tpu.memory_space<vmem>>, vector<16x64xf32>,
      %cst_97 = arith.constant 0.000000e+00 : f32
      %280 = vector.broadcast %cst_97 : f32 to vector<8x64xf32>
      %c0_98 = arith.constant 0 : index
      %c0_99 = arith.constant 0 : index
      %281 = vector.load %arg14[%c0_98, %c0_99] : memref<8x64xf32, #tpu.memory_space<vmem>>, vector<8x64xf32>
      tpu.vector_store %arg14[%c0_98, %c0_99], %280 {strides = array<i32>} : memref<8x64xf32, #tpu.memory_space<vmem>>, vector<8x64xf32>,
    } else {
    }
    %c0 = arith.constant 0 : index
    %c0_1 = arith.constant 0 : index
    %c0_2 = arith.constant 0 : index
    %3 = vector.load %arg2[%c0, %c0_1, %c0_2] : memref<1x8x32xf32, #tpu.memory_space<vmem>>, vector<1x8x32xf32>
    %4 = vector.shape_cast %3 : vector<1x8x32xf32> to vector<8x32xf32>
    %5 = arith.truncf %4 : vector<8x32xf32> to vector<8x32xbf16>
    %c0_3 = arith.constant 0 : index
    %c0_4 = arith.constant 0 : index
    %6 = vector.load %arg3[%c0_3, %c0_4] : memref<32x128xbf16, #tpu.memory_space<vmem>>, vector<32x128xbf16>
    %cst = arith.constant dense<0.000000e+00> : vector<8x128xf32>
    %7 = tpu.matmul %5, %6, %cst {dimension_numbers = #tpu.dot_dimension_numbers<[1], [0], [0], [1], [0, 0, 1, 1], [], []>} : vector<8x32xbf16>, vector<32x128xbf16>, vector<8x128xf32> -> vector<8x128xf32>
    %8 = vector.extract_strided_slice %7 {offsets = [0, 0], sizes = [8, 64], strides = [1, 1]} : vector<8x128xf32> to vector<8x64xf32>
    %9 = vector.extract_strided_slice %7 {offsets = [0, 64], sizes = [8, 64], strides = [1, 1]} : vector<8x128xf32> to vector<8x64xf32>
    %10 = tpu.iota {dimensions = array<i32: 0>} : vector<8x64xi32>
    %cst_5 = arith.constant 0.000000e+00 : f32
    %11 = vector.broadcast %cst_5 : f32 to vector<8x64xf32>
    %c0_6 = arith.constant 0 : index
    %c0_7 = arith.constant 0 : index
    %12 = vector.load %arg5[%c0_6, %c0_7] : memref<1x64xf32, #tpu.memory_space<vmem>>, vector<1x64xf32>
    %13 = vector.broadcast %12 : vector<1x64xf32> to vector<8x64xf32>
    %14 = arith.addf %11, %13 : vector<8x64xf32>
    %c0_8 = arith.constant 0 : index
    %c0_9 = arith.constant 0 : index
    %15 = vector.load %arg4[%c0_8, %c0_9] : memref<4x64xf32, #tpu.memory_space<vmem>>, vector<1x64xf32>
    %c3_i32 = arith.constant 3 : i32
    %16 = tpu.dynamic_rotate %8 by %c3_i32 dim 0 : vector<8x64xf32>, i32 -> vector<8x64xf32>
    %c3_i32_10 = arith.constant 3 : i32
    %17 = vector.broadcast %c3_i32_10 : i32 to vector<8x64xi32>
    %18 = arith.cmpi sge, %10, %17 : vector<8x64xi32>
    %cst_11 = arith.constant 0.000000e+00 : f32
    %19 = vector.broadcast %cst_11 : f32 to vector<8x64xf32>
    %20 = arith.select %18, %16, %19 : vector<8x64xi1>, vector<8x64xf32>
    %21 = vector.broadcast %15 : vector<1x64xf32> to vector<8x64xf32>
    %22 = arith.mulf %21, %20 : vector<8x64xf32>
    %23 = arith.addf %14, %22 : vector<8x64xf32>
    %c1 = arith.constant 1 : index
    %c0_12 = arith.constant 0 : index
    %24 = vector.load %arg4[%c1, %c0_12] : memref<4x64xf32, #tpu.memory_space<vmem>>, vector<1x64xf32>
    %c2_i32 = arith.constant 2 : i32
    %25 = tpu.dynamic_rotate %8 by %c2_i32 dim 0 : vector<8x64xf32>, i32 -> vector<8x64xf32>
    %c2_i32_13 = arith.constant 2 : i32
    %26 = vector.broadcast %c2_i32_13 : i32 to vector<8x64xi32>
    %27 = arith.cmpi sge, %10, %26 : vector<8x64xi32>
    %cst_14 = arith.constant 0.000000e+00 : f32
    %28 = vector.broadcast %cst_14 : f32 to vector<8x64xf32>
    %29 = arith.select %27, %25, %28 : vector<8x64xi1>, vector<8x64xf32>
    %30 = vector.broadcast %24 : vector<1x64xf32> to vector<8x64xf32>
    %31 = arith.mulf %30, %29 : vector<8x64xf32>
    %32 = arith.addf %23, %31 : vector<8x64xf32>
    %c2 = arith.constant 2 : index
    %c0_15 = arith.constant 0 : index
    %33 = vector.load %arg4[%c2, %c0_15] : memref<4x64xf32, #tpu.memory_space<vmem>>, vector<1x64xf32>
    %c1_i32 = arith.constant 1 : i32
    %34 = tpu.dynamic_rotate %8 by %c1_i32 dim 0 : vector<8x64xf32>, i32 -> vector<8x64xf32>
    %c1_i32_16 = arith.constant 1 : i32
    %35 = vector.broadcast %c1_i32_16 : i32 to vector<8x64xi32>
    %36 = arith.cmpi sge, %10, %35 : vector<8x64xi32>
    %cst_17 = arith.constant 0.000000e+00 : f32
    %37 = vector.broadcast %cst_17 : f32 to vector<8x64xf32>
    %38 = arith.select %36, %34, %37 : vector<8x64xi1>, vector<8x64xf32>
    %39 = vector.broadcast %33 : vector<1x64xf32> to vector<8x64xf32>
    %40 = arith.mulf %39, %38 : vector<8x64xf32>
    %41 = arith.addf %32, %40 : vector<8x64xf32>
    %c3 = arith.constant 3 : index
    %c0_18 = arith.constant 0 : index
    %42 = vector.load %arg4[%c3, %c0_18] : memref<4x64xf32, #tpu.memory_space<vmem>>, vector<1x64xf32>
    %43 = vector.broadcast %42 : vector<1x64xf32> to vector<8x64xf32>
    %44 = arith.mulf %43, %8 : vector<8x64xf32>
    %45 = arith.addf %41, %44 : vector<8x64xf32>
    %46 = tpu.iota {dimensions = array<i32: 0>} : vector<8x64xi32>
    %c0_19 = arith.constant 0 : index
    %c0_20 = arith.constant 0 : index
    %47 = vector.load %arg14[%c0_19, %c0_20] : memref<8x64xf32, #tpu.memory_space<vmem>>, vector<8x64xf32>
    %cst_21 = arith.constant 0.000000e+00 : f32
    %48 = vector.broadcast %cst_21 : f32 to vector<8x64xf32>
    %c0_22 = arith.constant 0 : index
    %c0_23 = arith.constant 0 : index
    %49 = vector.load %arg4[%c0_22, %c0_23] : memref<4x64xf32, #tpu.memory_space<vmem>>, vector<1x64xf32>
    %c3_i32_24 = arith.constant 3 : i32
    %50 = vector.broadcast %c3_i32_24 : i32 to vector<8x64xi32>
    %51 = arith.cmpi slt, %46, %50 : vector<8x64xi32>
    %c3_i32_25 = arith.constant 3 : i32
    %52 = tpu.dynamic_rotate %47 by %c3_i32_25 dim 0 : vector<8x64xf32>, i32 -> vector<8x64xf32>
    %cst_26 = arith.constant 0.000000e+00 : f32
    %53 = vector.broadcast %cst_26 : f32 to vector<8x64xf32>
    %54 = arith.select %51, %52, %53 : vector<8x64xi1>, vector<8x64xf32>
    %55 = vector.broadcast %49 : vector<1x64xf32> to vector<8x64xf32>
    %56 = arith.mulf %55, %54 : vector<8x64xf32>
    %57 = arith.addf %48, %56 : vector<8x64xf32>
    %c1_27 = arith.constant 1 : index
    %c0_28 = arith.constant 0 : index
    %58 = vector.load %arg4[%c1_27, %c0_28] : memref<4x64xf32, #tpu.memory_space<vmem>>, vector<1x64xf32>
    %c2_i32_29 = arith.constant 2 : i32
    %59 = vector.broadcast %c2_i32_29 : i32 to vector<8x64xi32>
    %60 = arith.cmpi slt, %46, %59 : vector<8x64xi32>
    %c2_i32_30 = arith.constant 2 : i32
    %61 = tpu.dynamic_rotate %47 by %c2_i32_30 dim 0 : vector<8x64xf32>, i32 -> vector<8x64xf32>
    %cst_31 = arith.constant 0.000000e+00 : f32
    %62 = vector.broadcast %cst_31 : f32 to vector<8x64xf32>
    %63 = arith.select %60, %61, %62 : vector<8x64xi1>, vector<8x64xf32>
    %64 = vector.broadcast %58 : vector<1x64xf32> to vector<8x64xf32>
    %65 = arith.mulf %64, %63 : vector<8x64xf32>
    %66 = arith.addf %57, %65 : vector<8x64xf32>
    %c2_32 = arith.constant 2 : index
    %c0_33 = arith.constant 0 : index
    %67 = vector.load %arg4[%c2_32, %c0_33] : memref<4x64xf32, #tpu.memory_space<vmem>>, vector<1x64xf32>
    %c1_i32_34 = arith.constant 1 : i32
    %68 = vector.broadcast %c1_i32_34 : i32 to vector<8x64xi32>
    %69 = arith.cmpi slt, %46, %68 : vector<8x64xi32>
    %c1_i32_35 = arith.constant 1 : i32
    %70 = tpu.dynamic_rotate %47 by %c1_i32_35 dim 0 : vector<8x64xf32>, i32 -> vector<8x64xf32>
    %cst_36 = arith.constant 0.000000e+00 : f32
    %71 = vector.broadcast %cst_36 : f32 to vector<8x64xf32>
    %72 = arith.select %69, %70, %71 : vector<8x64xi1>, vector<8x64xf32>
    %73 = vector.broadcast %67 : vector<1x64xf32> to vector<8x64xf32>
    %74 = arith.mulf %73, %72 : vector<8x64xf32>
    %75 = arith.addf %66, %74 : vector<8x64xf32>
    %c0_37 = arith.constant 0 : index
    %c0_38 = arith.constant 0 : index
    %76 = vector.load %arg15[%c0_37, %c0_38] : memref<8x64xf32, #tpu.memory_space<vmem>>, vector<8x64xf32>
    tpu.vector_store %arg15[%c0_37, %c0_38], %45 {strides = array<i32>} : memref<8x64xf32, #tpu.memory_space<vmem>>, vector<8x64xf32>,
    %c0_39 = arith.constant 0 : index
    %c0_40 = arith.constant 0 : index
    %77 = vector.load %arg15[%c0_39, %c0_40] : memref<8x64xf32, #tpu.memory_space<vmem>>, vector<8x64xf32>
    %78 = arith.addf %77, %75 : vector<8x64xf32>
    %c0_41 = arith.constant 0 : index
    %c0_42 = arith.constant 0 : index
    %79 = vector.load %arg15[%c0_41, %c0_42] : memref<8x64xf32, #tpu.memory_space<vmem>>, vector<8x64xf32>
    tpu.vector_store %arg15[%c0_41, %c0_42], %78 {strides = array<i32>} : memref<8x64xf32, #tpu.memory_space<vmem>>, vector<8x64xf32>,
    %c0_43 = arith.constant 0 : index
    %c0_44 = arith.constant 0 : index
    %80 = vector.load %arg15[%c0_43, %c0_44] : memref<8x64xf32, #tpu.memory_space<vmem>>, vector<8x64xf32>
    %81 = vector.extract_strided_slice %8 {offsets = [5, 0], sizes = [3, 64], strides = [1, 1]} : vector<8x64xf32> to vector<3x64xf32>
    %c5 = arith.constant 5 : index
    %c0_45 = arith.constant 0 : index
    %82 = vector.load %arg14[%c5, %c0_45] : memref<8x64xf32, #tpu.memory_space<vmem>>, vector<3x64xf32>
    tpu.vector_store %arg14[%c5, %c0_45], %81 {strides = array<i32>} : memref<8x64xf32, #tpu.memory_space<vmem>>, vector<3x64xf32>,
    %83 = arith.negf %80 : vector<8x64xf32>
    %84 = math.exp %83 : vector<8x64xf32>
    %cst_46 = arith.constant 1.000000e+00 : f32
    %85 = vector.broadcast %cst_46 : f32 to vector<8x64xf32>
    %86 = arith.addf %85, %84 : vector<8x64xf32>
    %87 = arith.divf %85, %86 : vector<8x64xf32>
    %88 = arith.mulf %80, %87 : vector<8x64xf32>
    %89 = arith.truncf %88 : vector<8x64xf32> to vector<8x64xbf16>
    %c0_47 = arith.constant 0 : index
    %c0_48 = arith.constant 0 : index
    %90 = vector.load %arg6[%c0_47, %c0_48] : memref<64x34xbf16, #tpu.memory_space<vmem>>, vector<64x34xbf16>
    %cst_49 = arith.constant dense<0.000000e+00> : vector<8x34xf32>
    %91 = tpu.matmul %89, %90, %cst_49 {dimension_numbers = #tpu.dot_dimension_numbers<[1], [0], [0], [1], [0, 0, 1, 1], [], []>} : vector<8x64xbf16>, vector<64x34xbf16>, vector<8x34xf32> -> vector<8x34xf32>
    %92 = vector.extract_strided_slice %91 {offsets = [0, 0], sizes = [8, 2], strides = [1, 1]} : vector<8x34xf32> to vector<8x2xf32>
    %c0_50 = arith.constant 0 : index
    %c0_51 = arith.constant 0 : index
    %93 = vector.load %arg7[%c0_50, %c0_51] : memref<2x64xf32, #tpu.memory_space<vmem>>, vector<2x64xf32>
    %cst_52 = arith.constant dense<0.000000e+00> : vector<8x64xf32>
    %94 = tpu.matmul %92, %93, %cst_52 {dimension_numbers = #tpu.dot_dimension_numbers<[1], [0], [0], [1], [0, 0, 1, 1], [], []>} : vector<8x2xf32>, vector<2x64xf32>, vector<8x64xf32> -> vector<8x64xf32>
    %c0_53 = arith.constant 0 : index
    %c0_54 = arith.constant 0 : index
    %95 = vector.load %arg8[%c0_53, %c0_54] : memref<1x64xf32, #tpu.memory_space<vmem>>, vector<1x64xf32>
    %96 = vector.broadcast %95 : vector<1x64xf32> to vector<8x64xf32>
    %97 = arith.addf %94, %96 : vector<8x64xf32>
    %cst_55 = arith.constant 0.000000e+00 : f32
    %98 = vector.broadcast %cst_55 : f32 to vector<8x64xf32>
    %99 = arith.maximumf %97, %98 : vector<8x64xf32>
    %100 = vector.broadcast %cst_55 : f32 to vector<8x64xf32>
    %101 = arith.subf %97, %100 : vector<8x64xf32>
    %102 = arith.cmpf one, %101, %101 : vector<8x64xf32>
    %103 = vector.broadcast %cst_55 : f32 to vector<8x64xf32>
    %104 = arith.addf %97, %103 : vector<8x64xf32>
    %105 = math.absf %101 : vector<8x64xf32>
    %cst_56 = arith.constant 0.000000e+00 : f32
    %106 = vector.broadcast %cst_56 : f32 to vector<8x64xf32>
    %107 = arith.subf %106, %105 : vector<8x64xf32>
    %108 = math.exp %107 : vector<8x64xf32>
    %109 = math.log1p %108 : vector<8x64xf32>
    %110 = arith.addf %99, %109 : vector<8x64xf32>
    %111 = arith.select %102, %104, %110 : vector<8x64xi1>, vector<8x64xf32>
    %c0_57 = arith.constant 0 : index
    %c0_58 = arith.constant 0 : index
    %112 = vector.load %arg15[%c0_57, %c0_58] : memref<8x64xf32, #tpu.memory_space<vmem>>, vector<8x64xf32>
    tpu.vector_store %arg15[%c0_57, %c0_58], %111 {strides = array<i32>} : memref<8x64xf32, #tpu.memory_space<vmem>>, vector<8x64xf32>,
    %113 = arith.mulf %111, %88 : vector<8x64xf32>
    %c0_59 = arith.constant 0 : index
    %c0_60 = arith.constant 0 : index
    %114 = vector.load %arg16[%c0_59, %c0_60] : memref<8x64xf32, #tpu.memory_space<vmem>>, vector<8x64xf32>
    tpu.vector_store %arg16[%c0_59, %c0_60], %113 {strides = array<i32>} : memref<8x64xf32, #tpu.memory_space<vmem>>, vector<8x64xf32>,
    %115 = vector.extract_strided_slice %91 {offsets = [0, 2], sizes = [8, 32], strides = [1, 1]} : vector<8x34xf32> to vector<8x32xf32>
    %c0_61 = arith.constant 0 : index
    %c0_62 = arith.constant 0 : index
    %116 = vector.load %arg17[%c0_61, %c0_62] : memref<8x32xf32, #tpu.memory_space<vmem>>, vector<8x32xf32>
    tpu.vector_store %arg17[%c0_61, %c0_62], %115 {strides = array<i32>} : memref<8x32xf32, #tpu.memory_space<vmem>>, vector<8x32xf32>,
    %c0_63 = arith.constant 0 : index
    %c0_64 = arith.constant 0 : index
    %117 = vector.load %arg9[%c0_63, %c0_64] : memref<16x64xf32, #tpu.memory_space<vmem>>, vector<16x64xf32>
    %c0_65 = arith.constant 0 : index
    %c0_66 = arith.constant 0 : index
    %118 = vector.load %arg13[%c0_65, %c0_66] : memref<16x64xf32, #tpu.memory_space<vmem>>, vector<16x64xf32>
    %c0_i32_67 = arith.constant 0 : i32
    %c8_i32 = arith.constant 8 : i32
    %119 = arith.muli %c0_i32_67, %c8_i32 : i32
    %120 = tpu.assume_multiple %119, 8 : i32
    %121 = arith.index_cast %120 : i32 to index
    %c0_68 = arith.constant 0 : index
    %122 = vector.load %arg15[%121, %c0_68] : memref<8x64xf32, #tpu.memory_space<vmem>>, vector<8x64xf32>
    %123 = arith.index_cast %120 : i32 to index
    %c0_69 = arith.constant 0 : index
    %124 = vector.load %arg16[%123, %c0_69] : memref<8x64xf32, #tpu.memory_space<vmem>>, vector<8x64xf32>
    %125 = arith.index_cast %120 : i32 to index
    %c0_70 = arith.constant 0 : index
    %126 = vector.load %arg17[%125, %c0_70] : memref<8x32xf32, #tpu.memory_space<vmem>>, vector<8x32xf32>
    %127 = tpu.transpose %126, [1, 0] : vector<8x32xf32> -> vector<32x8xf32>
    %128 = vector.extract_strided_slice %122 {offsets = [0, 0], sizes = [1, 64], strides = [1, 1]} : vector<8x64xf32> to vector<1x64xf32>
    %129 = vector.broadcast %128 : vector<1x64xf32> to vector<16x64xf32>
    %130 = arith.mulf %129, %117 : vector<16x64xf32>
    %131 = math.exp %130 : vector<16x64xf32>
    %132 = arith.mulf %131, %118 : vector<16x64xf32>
    %133 = vector.extract_strided_slice %124 {offsets = [0, 0], sizes = [1, 64], strides = [1, 1]} : vector<8x64xf32> to vector<1x64xf32>
    %134 = vector.extract_strided_slice %127 {offsets = [0, 0], sizes = [16, 1], strides = [1, 1]} : vector<32x8xf32> to vector<16x1xf32>
    %135 = vector.broadcast %133 : vector<1x64xf32> to vector<16x64xf32>
    %136 = vector.broadcast %134 : vector<16x1xf32> to vector<16x64xf32>
    %137 = arith.mulf %135, %136 : vector<16x64xf32>
    %138 = arith.addf %132, %137 : vector<16x64xf32>
    %139 = vector.extract_strided_slice %127 {offsets = [16, 0], sizes = [16, 1], strides = [1, 1]} : vector<32x8xf32> to vector<16x1xf32>
    %140 = vector.broadcast %139 : vector<16x1xf32> to vector<16x64xf32>
    %141 = arith.mulf %138, %140 : vector<16x64xf32>
    %cst_71 = arith.constant dense<0.000000e+00> : vector<64xf32>
    %142 = vector.multi_reduction <add>, %141, %cst_71 [0] : vector<16x64xf32> to vector<64xf32>
    %143 = vector.shape_cast %142 : vector<64xf32> to vector<1x64xf32>
    %144 = vector.extract_strided_slice %122 {offsets = [1, 0], sizes = [1, 64], strides = [1, 1]} : vector<8x64xf32> to vector<1x64xf32>
    %145 = vector.broadcast %144 : vector<1x64xf32> to vector<16x64xf32>
    %146 = arith.mulf %145, %117 : vector<16x64xf32>
    %147 = math.exp %146 : vector<16x64xf32>
    %148 = arith.mulf %147, %138 : vector<16x64xf32>
    %149 = vector.extract_strided_slice %124 {offsets = [1, 0], sizes = [1, 64], strides = [1, 1]} : vector<8x64xf32> to vector<1x64xf32>
    %150 = vector.extract_strided_slice %127 {offsets = [0, 1], sizes = [16, 1], strides = [1, 1]} : vector<32x8xf32> to vector<16x1xf32>
    %151 = vector.broadcast %149 : vector<1x64xf32> to vector<16x64xf32>
    %152 = vector.broadcast %150 : vector<16x1xf32> to vector<16x64xf32>
    %153 = arith.mulf %151, %152 : vector<16x64xf32>
    %154 = arith.addf %148, %153 : vector<16x64xf32>
    %155 = vector.extract_strided_slice %127 {offsets = [16, 1], sizes = [16, 1], strides = [1, 1]} : vector<32x8xf32> to vector<16x1xf32>
    %156 = vector.broadcast %155 : vector<16x1xf32> to vector<16x64xf32>
    %157 = arith.mulf %154, %156 : vector<16x64xf32>
    %cst_72 = arith.constant dense<0.000000e+00> : vector<64xf32>
    %158 = vector.multi_reduction <add>, %157, %cst_72 [0] : vector<16x64xf32> to vector<64xf32>
    %159 = vector.shape_cast %158 : vector<64xf32> to vector<1x64xf32>
    %160 = vector.extract_strided_slice %122 {offsets = [2, 0], sizes = [1, 64], strides = [1, 1]} : vector<8x64xf32> to vector<1x64xf32>
    %161 = vector.broadcast %160 : vector<1x64xf32> to vector<16x64xf32>
    %162 = arith.mulf %161, %117 : vector<16x64xf32>
    %163 = math.exp %162 : vector<16x64xf32>
    %164 = arith.mulf %163, %154 : vector<16x64xf32>
    %165 = vector.extract_strided_slice %124 {offsets = [2, 0], sizes = [1, 64], strides = [1, 1]} : vector<8x64xf32> to vector<1x64xf32>
    %166 = vector.extract_strided_slice %127 {offsets = [0, 2], sizes = [16, 1], strides = [1, 1]} : vector<32x8xf32> to vector<16x1xf32>
    %167 = vector.broadcast %165 : vector<1x64xf32> to vector<16x64xf32>
    %168 = vector.broadcast %166 : vector<16x1xf32> to vector<16x64xf32>
    %169 = arith.mulf %167, %168 : vector<16x64xf32>
    %170 = arith.addf %164, %169 : vector<16x64xf32>
    %171 = vector.extract_strided_slice %127 {offsets = [16, 2], sizes = [16, 1], strides = [1, 1]} : vector<32x8xf32> to vector<16x1xf32>
    %172 = vector.broadcast %171 : vector<16x1xf32> to vector<16x64xf32>
    %173 = arith.mulf %170, %172 : vector<16x64xf32>
    %cst_73 = arith.constant dense<0.000000e+00> : vector<64xf32>
    %174 = vector.multi_reduction <add>, %173, %cst_73 [0] : vector<16x64xf32> to vector<64xf32>
    %175 = vector.shape_cast %174 : vector<64xf32> to vector<1x64xf32>
    %176 = vector.extract_strided_slice %122 {offsets = [3, 0], sizes = [1, 64], strides = [1, 1]} : vector<8x64xf32> to vector<1x64xf32>
    %177 = vector.broadcast %176 : vector<1x64xf32> to vector<16x64xf32>
    %178 = arith.mulf %177, %117 : vector<16x64xf32>
    %179 = math.exp %178 : vector<16x64xf32>
    %180 = arith.mulf %179, %170 : vector<16x64xf32>
    %181 = vector.extract_strided_slice %124 {offsets = [3, 0], sizes = [1, 64], strides = [1, 1]} : vector<8x64xf32> to vector<1x64xf32>
    %182 = vector.extract_strided_slice %127 {offsets = [0, 3], sizes = [16, 1], strides = [1, 1]} : vector<32x8xf32> to vector<16x1xf32>
    %183 = vector.broadcast %181 : vector<1x64xf32> to vector<16x64xf32>
    %184 = vector.broadcast %182 : vector<16x1xf32> to vector<16x64xf32>
    %185 = arith.mulf %183, %184 : vector<16x64xf32>
    %186 = arith.addf %180, %185 : vector<16x64xf32>
    %187 = vector.extract_strided_slice %127 {offsets = [16, 3], sizes = [16, 1], strides = [1, 1]} : vector<32x8xf32> to vector<16x1xf32>
    %188 = vector.broadcast %187 : vector<16x1xf32> to vector<16x64xf32>
    %189 = arith.mulf %186, %188 : vector<16x64xf32>
    %cst_74 = arith.constant dense<0.000000e+00> : vector<64xf32>
    %190 = vector.multi_reduction <add>, %189, %cst_74 [0] : vector<16x64xf32> to vector<64xf32>
    %191 = vector.shape_cast %190 : vector<64xf32> to vector<1x64xf32>
    %192 = vector.extract_strided_slice %122 {offsets = [4, 0], sizes = [1, 64], strides = [1, 1]} : vector<8x64xf32> to vector<1x64xf32>
    %193 = vector.broadcast %192 : vector<1x64xf32> to vector<16x64xf32>
    %194 = arith.mulf %193, %117 : vector<16x64xf32>
    %195 = math.exp %194 : vector<16x64xf32>
    %196 = arith.mulf %195, %186 : vector<16x64xf32>
    %197 = vector.extract_strided_slice %124 {offsets = [4, 0], sizes = [1, 64], strides = [1, 1]} : vector<8x64xf32> to vector<1x64xf32>
    %198 = vector.extract_strided_slice %127 {offsets = [0, 4], sizes = [16, 1], strides = [1, 1]} : vector<32x8xf32> to vector<16x1xf32>
    %199 = vector.broadcast %197 : vector<1x64xf32> to vector<16x64xf32>
    %200 = vector.broadcast %198 : vector<16x1xf32> to vector<16x64xf32>
    %201 = arith.mulf %199, %200 : vector<16x64xf32>
    %202 = arith.addf %196, %201 : vector<16x64xf32>
    %203 = vector.extract_strided_slice %127 {offsets = [16, 4], sizes = [16, 1], strides = [1, 1]} : vector<32x8xf32> to vector<16x1xf32>
    %204 = vector.broadcast %203 : vector<16x1xf32> to vector<16x64xf32>
    %205 = arith.mulf %202, %204 : vector<16x64xf32>
    %cst_75 = arith.constant dense<0.000000e+00> : vector<64xf32>
    %206 = vector.multi_reduction <add>, %205, %cst_75 [0] : vector<16x64xf32> to vector<64xf32>
    %207 = vector.shape_cast %206 : vector<64xf32> to vector<1x64xf32>
    %208 = vector.extract_strided_slice %122 {offsets = [5, 0], sizes = [1, 64], strides = [1, 1]} : vector<8x64xf32> to vector<1x64xf32>
    %209 = vector.broadcast %208 : vector<1x64xf32> to vector<16x64xf32>
    %210 = arith.mulf %209, %117 : vector<16x64xf32>
    %211 = math.exp %210 : vector<16x64xf32>
    %212 = arith.mulf %211, %202 : vector<16x64xf32>
    %213 = vector.extract_strided_slice %124 {offsets = [5, 0], sizes = [1, 64], strides = [1, 1]} : vector<8x64xf32> to vector<1x64xf32>
    %214 = vector.extract_strided_slice %127 {offsets = [0, 5], sizes = [16, 1], strides = [1, 1]} : vector<32x8xf32> to vector<16x1xf32>
    %215 = vector.broadcast %213 : vector<1x64xf32> to vector<16x64xf32>
    %216 = vector.broadcast %214 : vector<16x1xf32> to vector<16x64xf32>
    %217 = arith.mulf %215, %216 : vector<16x64xf32>
    %218 = arith.addf %212, %217 : vector<16x64xf32>
    %219 = vector.extract_strided_slice %127 {offsets = [16, 5], sizes = [16, 1], strides = [1, 1]} : vector<32x8xf32> to vector<16x1xf32>
    %220 = vector.broadcast %219 : vector<16x1xf32> to vector<16x64xf32>
    %221 = arith.mulf %218, %220 : vector<16x64xf32>
    %cst_76 = arith.constant dense<0.000000e+00> : vector<64xf32>
    %222 = vector.multi_reduction <add>, %221, %cst_76 [0] : vector<16x64xf32> to vector<64xf32>
    %223 = vector.shape_cast %222 : vector<64xf32> to vector<1x64xf32>
    %224 = vector.extract_strided_slice %122 {offsets = [6, 0], sizes = [1, 64], strides = [1, 1]} : vector<8x64xf32> to vector<1x64xf32>
    %225 = vector.broadcast %224 : vector<1x64xf32> to vector<16x64xf32>
    %226 = arith.mulf %225, %117 : vector<16x64xf32>
    %227 = math.exp %226 : vector<16x64xf32>
    %228 = arith.mulf %227, %218 : vector<16x64xf32>
    %229 = vector.extract_strided_slice %124 {offsets = [6, 0], sizes = [1, 64], strides = [1, 1]} : vector<8x64xf32> to vector<1x64xf32>
    %230 = vector.extract_strided_slice %127 {offsets = [0, 6], sizes = [16, 1], strides = [1, 1]} : vector<32x8xf32> to vector<16x1xf32>
    %231 = vector.broadcast %229 : vector<1x64xf32> to vector<16x64xf32>
    %232 = vector.broadcast %230 : vector<16x1xf32> to vector<16x64xf32>
    %233 = arith.mulf %231, %232 : vector<16x64xf32>
    %234 = arith.addf %228, %233 : vector<16x64xf32>
    %235 = vector.extract_strided_slice %127 {offsets = [16, 6], sizes = [16, 1], strides = [1, 1]} : vector<32x8xf32> to vector<16x1xf32>
    %236 = vector.broadcast %235 : vector<16x1xf32> to vector<16x64xf32>
    %237 = arith.mulf %234, %236 : vector<16x64xf32>
    %cst_77 = arith.constant dense<0.000000e+00> : vector<64xf32>
    %238 = vector.multi_reduction <add>, %237, %cst_77 [0] : vector<16x64xf32> to vector<64xf32>
    %239 = vector.shape_cast %238 : vector<64xf32> to vector<1x64xf32>
    %240 = vector.extract_strided_slice %122 {offsets = [7, 0], sizes = [1, 64], strides = [1, 1]} : vector<8x64xf32> to vector<1x64xf32>
    %241 = vector.broadcast %240 : vector<1x64xf32> to vector<16x64xf32>
    %242 = arith.mulf %241, %117 : vector<16x64xf32>
    %243 = math.exp %242 : vector<16x64xf32>
    %244 = arith.mulf %243, %234 : vector<16x64xf32>
    %245 = vector.extract_strided_slice %124 {offsets = [7, 0], sizes = [1, 64], strides = [1, 1]} : vector<8x64xf32> to vector<1x64xf32>
    %246 = vector.extract_strided_slice %127 {offsets = [0, 7], sizes = [16, 1], strides = [1, 1]} : vector<32x8xf32> to vector<16x1xf32>
    %247 = vector.broadcast %245 : vector<1x64xf32> to vector<16x64xf32>
    %248 = vector.broadcast %246 : vector<16x1xf32> to vector<16x64xf32>
    %249 = arith.mulf %247, %248 : vector<16x64xf32>
    %250 = arith.addf %244, %249 : vector<16x64xf32>
    %251 = vector.extract_strided_slice %127 {offsets = [16, 7], sizes = [16, 1], strides = [1, 1]} : vector<32x8xf32> to vector<16x1xf32>
    %252 = vector.broadcast %251 : vector<16x1xf32> to vector<16x64xf32>
    %253 = arith.mulf %250, %252 : vector<16x64xf32>
    %cst_78 = arith.constant dense<0.000000e+00> : vector<64xf32>
    %254 = vector.multi_reduction <add>, %253, %cst_78 [0] : vector<16x64xf32> to vector<64xf32>
    %255 = vector.shape_cast %254 : vector<64xf32> to vector<1x64xf32>
    %256 = tpu.concatenate %143, %159, %175, %191, %207, %223, %239, %255 in 0 : vector<1x64xf32>, vector<1x64xf32>, vector<1x64xf32>, vector<1x64xf32>, vector<1x64xf32>, vector<1x64xf32>, vector<1x64xf32>, vector<1x64xf32> -> vector<8x64xf32>
    %257 = arith.index_cast %120 : i32 to index
    %c0_79 = arith.constant 0 : index
    %258 = vector.load %arg18[%257, %c0_79] : memref<8x64xf32, #tpu.memory_space<vmem>>, vector<8x64xf32>
    tpu.vector_store %arg18[%257, %c0_79], %256 {strides = array<i32>} : memref<8x64xf32, #tpu.memory_space<vmem>>, vector<8x64xf32>,
    %c1_i32_80 = arith.constant 1 : i32
    %c0_81 = arith.constant 0 : index
    %c0_82 = arith.constant 0 : index
    %259 = vector.load %arg13[%c0_81, %c0_82] : memref<16x64xf32, #tpu.memory_space<vmem>>, vector<16x64xf32>
    tpu.vector_store %arg13[%c0_81, %c0_82], %250 {strides = array<i32>} : memref<16x64xf32, #tpu.memory_space<vmem>>, vector<16x64xf32>,
    %c0_83 = arith.constant 0 : index
    %c0_84 = arith.constant 0 : index
    %260 = vector.load %arg18[%c0_83, %c0_84] : memref<8x64xf32, #tpu.memory_space<vmem>>, vector<8x64xf32>
    %c0_85 = arith.constant 0 : index
    %c0_86 = arith.constant 0 : index
    %261 = vector.load %arg10[%c0_85, %c0_86] : memref<1x64xf32, #tpu.memory_space<vmem>>, vector<1x64xf32>
    %262 = vector.broadcast %261 : vector<1x64xf32> to vector<8x64xf32>
    %263 = arith.mulf %88, %262 : vector<8x64xf32>
    %264 = arith.addf %260, %263 : vector<8x64xf32>
    %265 = arith.negf %9 : vector<8x64xf32>
    %266 = math.exp %265 : vector<8x64xf32>
    %cst_87 = arith.constant 1.000000e+00 : f32
    %267 = vector.broadcast %cst_87 : f32 to vector<8x64xf32>
    %268 = arith.addf %267, %266 : vector<8x64xf32>
    %269 = arith.divf %267, %268 : vector<8x64xf32>
    %270 = arith.mulf %9, %269 : vector<8x64xf32>
    %271 = arith.mulf %264, %270 : vector<8x64xf32>
    %272 = arith.truncf %271 : vector<8x64xf32> to vector<8x64xbf16>
    %c0_88 = arith.constant 0 : index
    %c0_89 = arith.constant 0 : index
    %273 = vector.load %arg11[%c0_88, %c0_89] : memref<64x32xbf16, #tpu.memory_space<vmem>>, vector<64x32xbf16>
    %cst_90 = arith.constant dense<0.000000e+00> : vector<8x32xf32>
    %274 = tpu.matmul %272, %273, %cst_90 {dimension_numbers = #tpu.dot_dimension_numbers<[1], [0], [0], [1], [0, 0, 1, 1], [], []>} : vector<8x64xbf16>, vector<64x32xbf16>, vector<8x32xf32> -> vector<8x32xf32>
    %c0_91 = arith.constant 0 : index
    %c0_92 = arith.constant 0 : index
    %c0_93 = arith.constant 0 : index
    %275 = vector.load %arg12[%c0_91, %c0_92, %c0_93] : memref<1x8x32xf32, #tpu.memory_space<vmem>>, vector<1x8x32xf32>
    %276 = vector.shape_cast %275 : vector<1x8x32xf32> to vector<8x32xf32>
    %277 = vector.shape_cast %274 : vector<8x32xf32> to vector<1x8x32xf32>
    tpu.vector_store %arg12[%c0_91, %c0_92, %c0_93], %277 {strides = array<i32>} : memref<1x8x32xf32, #tpu.memory_space<vmem>>, vector<1x8x32xf32>,
    return
  }
  func.func @transform_0(%arg0: i32, %arg1: i32) -> (i32, i32, i32) {
    %c0_i32 = arith.constant 0 : i32
    %c0_i32_0 = arith.constant 0 : i32
    return %arg0, %arg1, %c0_i32 : i32, i32, i32
  }
  func.func @transform_1(%arg0: i32, %arg1: i32) -> (i32, i32) {
    %c0_i32 = arith.constant 0 : i32
    %c0_i32_0 = arith.constant 0 : i32
    %c0_i32_1 = arith.constant 0 : i32
    return %c0_i32, %c0_i32_0 : i32, i32
  }
  func.func @transform_2(%arg0: i32, %arg1: i32) -> (i32, i32) {
    %c0_i32 = arith.constant 0 : i32
    %c0_i32_0 = arith.constant 0 : i32
    %c0_i32_1 = arith.constant 0 : i32
    return %c0_i32, %c0_i32_0 : i32, i32
  }
  func.func @transform_3(%arg0: i32, %arg1: i32) -> (i32, i32) {
    %c0_i32 = arith.constant 0 : i32
    %c0_i32_0 = arith.constant 0 : i32
    %c0_i32_1 = arith.constant 0 : i32
    return %c0_i32, %c0_i32_0 : i32, i32
  }
  func.func @transform_4(%arg0: i32, %arg1: i32) -> (i32, i32) {
    %c0_i32 = arith.constant 0 : i32
    %c0_i32_0 = arith.constant 0 : i32
    %c0_i32_1 = arith.constant 0 : i32
    return %c0_i32, %c0_i32_0 : i32, i32
  }
  func.func @transform_5(%arg0: i32, %arg1: i32) -> (i32, i32) {
    %c0_i32 = arith.constant 0 : i32
    %c0_i32_0 = arith.constant 0 : i32
    %c0_i32_1 = arith.constant 0 : i32
    return %c0_i32, %c0_i32_0 : i32, i32
  }
  func.func @transform_6(%arg0: i32, %arg1: i32) -> (i32, i32) {
    %c0_i32 = arith.constant 0 : i32
    %c0_i32_0 = arith.constant 0 : i32
    %c0_i32_1 = arith.constant 0 : i32
    return %c0_i32, %c0_i32_0 : i32, i32
  }
  func.func @transform_7(%arg0: i32, %arg1: i32) -> (i32, i32) {
    %c0_i32 = arith.constant 0 : i32
    %c0_i32_0 = arith.constant 0 : i32
    %c0_i32_1 = arith.constant 0 : i32
    return %c0_i32, %c0_i32_0 : i32, i32
  }
  func.func @transform_8(%arg0: i32, %arg1: i32) -> (i32, i32) {
    %c0_i32 = arith.constant 0 : i32
    %c0_i32_0 = arith.constant 0 : i32
    %c0_i32_1 = arith.constant 0 : i32
    return %c0_i32, %c0_i32_0 : i32, i32
  }
  func.func @transform_9(%arg0: i32, %arg1: i32) -> (i32, i32) {
    %c0_i32 = arith.constant 0 : i32
    %c0_i32_0 = arith.constant 0 : i32
    %c0_i32_1 = arith.constant 0 : i32
    return %c0_i32, %c0_i32_0 : i32, i32
  }
  func.func @transform_10(%arg0: i32, %arg1: i32) -> (i32, i32, i32) {
    %c0_i32 = arith.constant 0 : i32
    %c0_i32_0 = arith.constant 0 : i32
    return %arg0, %arg1, %c0_i32 : i32, i32, i32
  }
}

</mosaic_0001>

<bundles_post_ra>
// kernel: tpu_custom_call.1
= control target key start
LH: loop header
LB: loop body
LE: loop exit
PB: predicated region body
PF: predicated region fallthrough
CT: control target
= control target key end

     0   :  { %7 = vsyncpa [#allocation3], 0  ;;  %s651_s0 = inlined_call_operand.hbm [shape: f32[8,128], index: 0, kind: input, shape index: {}]   ;;  %s652_s1 = inlined_call_operand.hbm [shape: f32[16,128], index: 1, kind: input, shape index: {}]   ;;  %s653_s2 = inlined_call_operand.hbm [shape: f32[16,128], index: 2, kind: output, shape index: {}]  }
   0x1   :  { %8 = vsyncpa [#allocation6], 0 }
   0x2   :  { %10 = vsyncpa [#allocation6 + $0x1], 0 }
   0x3   :  { %11 = vsyncpa [#allocation4], 0 }
   0x4   :  { %13 = vsyncpa [#allocation4 + $0x1], 0  ;;  %s485_s9 = smov 0   ;;  %s487_s10 = smov 0  }
   0x5   :  { %s489_s11 = smov 0   ;;  %s491_s12 = smov 0  }
   0x6 LB: > { %s506_s13 = sadd.s32 4294967295, %s465_s12   ;;  %s272_s14 = sadd.s32 4294967294, %s465_s12   ;;  %s465_s12 = sphi %s491_s12, %s676_s12   ;;  %s461_s11 = sphi %s489_s11, %s675_s11   ;;  %s457_s10 = sphi %s487_s10, %s674_s10   ;;  %s453_s9 = sphi %s485_s9, %s673_s9  }
   0x7   : > { %p60_p0 = scmp.ne.s32.totalorder %s457_s10, %s453_s9  ;;  %p654_p1 = scmp.eq.s32.totalorder %s506_s13, 0 }
   0x8   : > { %p90_p3 = scmp.eq.s32.totalorder %s272_s14, 1  ;;  %p273_p5 = scmp.ge.s32.totalorder %s465_s12, 1 }
   0x9   : > { %p515_p4 = por %p654_p1, %p60_p0  ;;  %p97_p7 = scmp.lt.s32.totalorder %s465_s12, 3 }
   0xa   : > { %p520_p6 = por %p90_p3, %p60_p0  ;;  %s467_s18 = smov [#allocation2]  }
   0xb   : > { %s658_s15 = scalar_select %p515_p4, 1, 0 }
   0xc   : > { %s659_s16 = scalar_select %p520_p6, 1, 0 }
   0xd   : > { %p525_p8 = pnand %p273_p5, %p97_p7  ;;  %s110_s19 = sshll.u32 %s467_s18, 4  ;;  %s111_s19 = int_to_ptr.vmem [resolvable:$true] %s110_s19 }
   0xe   : > { %s533_s20 = sadd.s32 1, %s465_s12   ;;  %s47_s24 = sadd.s32 1, %s461_s11 }
   0xf   : > { %s660_s17 = scalar_select %p525_p8, 1, 0 }
  0x10   : > { %p294_p10 = pneg %p525_p8  ;;  %s44_s22 = ssub.s32 %s465_s12, %s533_s20 }
  0x11   : > { %p543_p12 = scmp.eq.s32.totalorder %s44_s22, 0  ;;  %p54_p13 = scmp.ne.s32.totalorder %s461_s11, %s457_s10 }
  0x12   : > { %p537_p11 = pnand %p294_p10, %p654_p1  ;;  %s354_s25 = scalar_lea.vmem %s111_s19, 128 }
  0x13   : > { %p355_p3 = scmp.ne.s32.totalorder %s111_s19, %s354_s25  ;;  %p362_p9 = scmp.lt.s32.totalorder %s111_s19, %s111_s19 }
  0x14   : > { %p345_p0 = pneg %p537_p11  ;;  %p363_p2 = scmp.lt.s32.totalorder %s354_s25, %s354_s25 }
  0x16   : > { %p357_p5 = pnand %p355_p3, %p345_p0  ;;  %p364_p10 = por %p363_p2, %p362_p9 }
  0x18   : > { %p358_p7 = pneg %p357_p5 }
  0x1a   : > { %p365_p1 = pnand %p364_p10, %p358_p7 }
  0x1c   : > { %368 = shalt.err (!%p365_p1)
}
  0x1d   : > { %297 = dma.hbm_to_vmem [thread:$0]  (!%p537_p11), %s651_s0, 128, %s111_s19, [#allocation3]  }
  0x1e   : > { %s560_s28 = scalar_select %p543_p12, %s461_s11, %s47_s24  }
  0x1f   : > { %p55_p1 = scmp.eq.s32.totalorder %s465_s12, 0  ;;  %p663_p2 = scmp.eq.s32.totalorder %s506_s13, 1 }
  0x20   : > { %p307_p0 = scmp.lt.s32.totalorder %s465_s12, 2  ;;  %s121_s30 = sand.u32 1, %s461_s11  }
  0x21   : > { %p568_p9 = por %p663_p2, %p54_p13  ;;  %p56_p3 = por %p55_p1, %p54_p13 }
  0x22   : > { %s276_s3 = sshll.u32 %s121_s30, 3  ;;  %s277_s4 = sshll.u32 %s465_s12, 7 }
  0x23   : > { %s664_s29 = scalar_select %p568_p9, 1, 0 }
  0x24   : > { %s581_s7 = scalar_lea.hbm %s652_s1, %s277_s4  ;;  %s125_s8 = scalar_lea.vmem [#allocation5], %s276_s3 }
  0x25   : > { %s132_s14 = sshll.u32 %s125_s8, 4  ;;  %p583_p11 = pnand %p307_p0, %p56_p3  ;;  %s133_s14 = int_to_ptr.vmem [resolvable:$true] %s132_s14 }
  0x26   : > { %s122_s19 = scalar_lea.sflag [#allocation6], %s121_s30  ;;  %s369_s21 = scalar_lea.hbm %s581_s7, 128 }
  0x27   : > { %p370_p12 = scmp.ne.s32.totalorder %s581_s7, %s369_s21  ;;  %p371_p13 = pneg %p583_p11 }
  0x28   : > { %s374_s24 = scalar_lea.hbm %s652_s1, 256  ;;  %p375_p10 = scmp.lt.s32.totalorder %s581_s7, %s652_s1 }
  0x29   : > { %p372_p5 = pnand %p371_p13, %p370_p12  ;;  %p376_p1 = scmp.lt.s32.totalorder %s374_s24, %s369_s21 }
  0x2b   : > { %p373_p7 = pneg %p372_p5  ;;  %p377_p2 = por %p376_p1, %p375_p10 }
  0x2d   : > { %p378_p0 = pnand %p377_p2, %p373_p7 }
  0x2f   : > { %381 = shalt.err (!%p378_p0)
}
  0x30   : > { %s382_s27 = scalar_lea.vmem %s133_s14, 128  ;;  %s468_s30 = smov [#allocation5]  }
  0x31   : > { %p383_p3 = scmp.ne.s32.totalorder %s133_s14, %s382_s27  ;;  %s387_s3 = sshll.u32 %s468_s30, 4  ;;  %s388_s3 = int_to_ptr.vmem [resolvable:$false] %s387_s3 }
  0x32   : > { %s389_s4 = scalar_lea.vmem %s388_s3, 256  ;;  %p390_p12 = scmp.lt.s32.totalorder %s133_s14, %s388_s3 }
  0x33   : > { %p385_p6 = pnand %p383_p3, %p371_p13  ;;  %p391_p5 = scmp.lt.s32.totalorder %s389_s4, %s382_s27 }
  0x35   : > { %p386_p9 = pneg %p385_p6  ;;  %p392_p4 = por %p391_p5, %p390_p12 }
  0x37   : > { %p393_p8 = pnand %p392_p4, %p386_p9 }
  0x39   : > { %396 = shalt.err (!%p393_p8)
}
  0x3a   : > { %301 = dma.hbm_to_vmem [thread:$0]  (!%p583_p11), %s581_s7, 128, %s133_s14, %s122_s19  }
  0x3b   : > { %p666_p7 = scmp.ne.s32.totalorder %s660_s17, 0 }
  0x3c   : > { %p667_p10 = scmp.eq.s32.totalorder (!%p666_p7), %s506_s13, 0 }
  0x3d   : > { %141 = sbr.rel (%p666_p7) target bundleno = 96 (0x60), region = 28 }
  0x42   : > { %440 = dma.done.wait (%p667_p10), [#allocation3], 128   ;;  %p668_p6 = pmov %p667_p10 }
  0x43   : > { %s608_s5 = sand.u32 1, %s457_s10   ;;  %p669_p4 = scmp.ne.s32.totalorder %s658_s15, 0 }
  0x44   : > { %442 = vsyncadd (%p668_p6), [#allocation3], 4294967168  ;;  %s280_s6 = sshll.u32 %s608_s5, 3  ;;  %s148_s8 = scalar_lea.sflag [#allocation6], %s608_s5 }
  0x45   : > { %s151_s18 = scalar_lea.vmem [#allocation5], %s280_s6 }
  0x46   : > { %444 = dma.done.wait (%p669_p4), %s148_s8, 128  }
  0x47   : > { %446 = vsyncadd (%p669_p4), %s148_s8, 4294967168  ;;  %s171_s17 = scalar_lea.vmem [#allocation7], %s280_s6  ;;  %s283_s14 = sshll.u32 %s506_s13, 7  ;;  %v172_v0 = vld [vmem:[%s151_s18] sm:$0xff]  ;;  %v173_v1 = vld [vmem:[#allocation2] sm:$0xff] }
  0x48   : > { %s190_s7 = sshll.u32 %s171_s17, 4  ;;  %v174_v2 = vadd.f32 %v173_v1, %v172_v0  ;;  %s188_s22 = scalar_lea.hbm %s653_s2, %s283_s14  ;;  %s191_s7 = int_to_ptr.vmem [resolvable:$true] %s190_s7 }
  0x49   : > { %s177_s23 = scalar_lea.sflag [#allocation4], %s608_s5  ;;  %s397_s24 = scalar_lea.vmem %s191_s7, 128 }
  0x4a   : > { %175 = vst [vmem:[%s171_s17] sm:$0xff] %v174_v2  ;;  %p398_p8 = scmp.ne.s32.totalorder %s191_s7, %s397_s24  ;;  %p670_p9 = scmp.ne.s32.totalorder %s664_s29, 0 }
  0x4b   : > { %s469_s15 = smov [#allocation7]  }
  0x4c   : > { %p399_p11 = pnand %p398_p8, %p670_p9  ;;  %s401_s25 = sshll.u32 %s469_s15, 4  ;;  %s402_s25 = int_to_ptr.vmem [resolvable:$false] %s401_s25 }
  0x4d   : > { %s403_s26 = scalar_lea.vmem %s402_s25, 256  ;;  %p404_p1 = scmp.lt.s32.totalorder %s191_s7, %s402_s25 }
  0x4e   : > { %p400_p13 = pneg %p399_p11  ;;  %p405_p2 = scmp.lt.s32.totalorder %s403_s26, %s397_s24 }
  0x50   : > { %p406_p0 = por %p405_p2, %p404_p1 }
  0x52   : > { %p407_p3 = pnand %p406_p0, %p400_p13 }
  0x54   : > { %410 = shalt.err (!%p407_p3)
}
  0x55   : > { %s411_s13 = scalar_lea.hbm %s188_s22, 128  ;;  %s415_s3 = scalar_lea.hbm %s653_s2, 256 }
  0x56   : > { %p412_p12 = scmp.ne.s32.totalorder %s188_s22, %s411_s13  ;;  %p416_p10 = scmp.lt.s32.totalorder %s188_s22, %s653_s2 }
  0x57   : > { %p417_p6 = scmp.lt.s32.totalorder %s415_s3, %s411_s13 }
  0x58   : > { %p413_p5 = pnand %p412_p12, %p670_p9 }
  0x59   : > { %p418_p4 = por %p417_p6, %p416_p10 }
  0x5a   : > { %p414_p7 = pneg %p413_p5 }
  0x5c   : > { %p419_p8 = pnand %p418_p4, %p414_p7 }
  0x5e   : > { %422 = shalt.err (!%p419_p8)
}
  0x5f   : > { %292 = dma.vmem_to_hbm [thread:$0]  (%p670_p9), %s191_s7, 128, %s188_s22, %s177_s23  }
  0x60 PF: > { %s202_s6 = sand.u32 1, %s453_s9   ;;  %p671_p11 = scmp.ne.s32.totalorder %s659_s16, 0 }
  0x61   : > { %p672_p13 = scmp.ge.s32.totalorder %s465_s12, 2  ;;  %s203_s8 = scalar_lea.sflag [#allocation4], %s202_s6 }
  0x63   : > { %p303_p1 = pnand %p672_p13, %p671_p11 }
  0x65   : > { %p304_p2 = pneg %p303_p1 }
  0x67   : > { %448 = dma.done.wait (%p304_p2), %s203_s8, 128  }
  0x68   : > { %450 = vsyncadd (%p304_p2), %s203_s8, 4294967168  ;;  %p16_p0 = scmp.ge.s32.totalorder %s533_s20, 4   ;;  %s673_s9 = smov %s457_s10 }
  0x69   : > { %s674_s10 = smov %s461_s11  ;;  %s675_s11 = smov %s560_s28 }
  0x6a   : > { %s676_s12 = smov %s533_s20  ;;  %18 = sbr.rel (!%p16_p0) target bundleno = 6 (0x6), region = 78 }
  0x6f   :  { %208 = vsyncpa [#allocation3], 1 }
  0x70   :  { %210 = vsyncpa [#allocation3 + $0x1], 1 }
  0x71   :  { %211 = vsyncpa [#allocation6], 1 }
  0x72   :  { %213 = vsyncpa [#allocation6 + $0x1], 1 }
  0x73   :  { %214 = vsyncpa [#allocation4], 1 }
  0x74   :  { %216 = vsyncpa [#allocation4 + $0x1], 1 }

// kernel: tpu_custom_call.1
= control target key start
LH: loop header
LB: loop body
LE: loop exit
PB: predicated region body
PF: predicated region fallthrough
CT: control target
= control target key end

     0   :  { %15 = vsyncpa [#allocation9], 0  ;;  %s2270_s0 = inlined_call_operand.vmem [shape: f32[2,16,32], index: 0, kind: input, shape index: {}]   ;;  %s2271_s1 = inlined_call_operand.vmem [shape: bf16[32,128], index: 1, kind: input, shape index: {}]   ;;  %s2272_s2 = inlined_call_operand.vmem [shape: f32[4,64], index: 2, kind: input, shape index: {}]   ;;  %s2273_s3 = inlined_call_operand.vmem [shape: f32[1,64], index: 3, kind: input, shape index: {}]   ;;  %s2274_s4 = inlined_call_operand.vmem [shape: bf16[64,34], index: 4, kind: input, shape index: {}]   ;;  %s2275_s5 = inlined_call_operand.vmem [shape: f32[2,64], index: 5, kind: input, shape index: {}]   ;;  %s2276_s6 = inlined_call_operand.vmem [shape: f32[1,64], index: 6, kind: input, shape index: {}]   ;;  %s2277_s7 = inlined_call_operand.vmem [shape: f32[16,64], index: 7, kind: input, shape index: {}]   ;;  %s2278_s8 = inlined_call_operand.vmem [shape: f32[1,64], index: 8, kind: input, shape index: {}]   ;;  %s2279_s9 = inlined_call_operand.vmem [shape: bf16[64,32], index: 9, kind: input, shape index: {}]   ;;  %s2280_s10 = inlined_call_operand.hbm [shape: f32[2,16,32], index: 10, kind: output, shape index: {}]  }
   0x1   :  { %17 = vsyncpa [#allocation9 + $0x1], 0  ;;  %s1770_s13 = smov 0   ;;  %s1772_s14 = smov 0  }
   0x2   :  { %s1774_s15 = smov 0   ;;  %s1776_s16 = smov 0  }
   0x3   :  { %s1778_s17 = smov 0   ;;  %s1780_s18 = smov 0  }
   0x4   :  { %s1782_s19 = smov 0   ;;  %s1784_s20 = smov 0  }
   0x5 LB: > { %2286 = sst [smem:[#allocation11_spill]] %s1691_s18  ;;  %s1347_s21 = sadd.s32 4294967295, %s1699_s20   ;;  %s1699_s20 = sphi %s1784_s20, %s23_s20   ;;  %s1695_s19 = sphi %s1782_s19, %s2298_s19   ;;  %s1691_s18 = sphi %s1780_s18, %s2297_s18   ;;  %s1687_s17 = sphi %s1778_s17, %s2296_s17   ;;  %s1683_s16 = sphi %s1776_s16, %s2295_s16   ;;  %s1679_s15 = sphi %s1774_s15, %s2301_s15   ;;  %s1675_s14 = sphi %s1772_s14, %s2300_s14   ;;  %s1671_s13 = sphi %s1770_s13, %s2299_s13  }
   0x6   : > { %2287 = sst [smem:[#allocation12_spill]] %s1695_s19  ;;  %s1348_s22 = sadd.s32 4294967294, %s1699_s20  }
   0x7   : > { %s32_s23 = sadd.s32 1, %s1691_s18  ;;  %s35_s24 = sadd.s32 1, %s1695_s19 }
   0x8   : > { %p33_p0 = scmp.ge.s32.totalorder %s32_s23, 2  ;;  %p271_p1 = scmp.ne.s32.totalorder %s1679_s15, %s1675_s14 }
   0x9   : > { %p272_p2 = scmp.eq.s32.totalorder %s1347_s21, 3  ;;  %p277_p5 = scmp.ne.s32.totalorder %s1675_s14, %s1671_s13 }
   0xa   : > { %s2303_s23 = smov (%p33_p0, %s32_s23), 0  ;;  %s2305_s24 = smov (!%p33_p0, %s35_s24), %s1695_s19 }
   0xb   : > { %2288 = sst [smem:[#allocation13_spill]] %s2303_s23  ;;  %s257_s25 = ssub.s32 %s1691_s18, %s2303_s23 }
   0xc   : > { %p1821_p3 = por %p272_p2, %p271_p1  ;;  %p37_p4 = scmp.ge.s32.totalorder %s2305_s24, 2 }
   0xd   : > { %p278_p6 = scmp.eq.s32.totalorder %s1348_s22, 3  ;;  %p1351_p7 = scmp.ge.s32.totalorder %s1699_s20, 1 }
   0xe   : > { %s2307_s24 = smov (%p37_p4, %s2305_s24), 0  ;;  %p334_p9 = scmp.lt.s32.totalorder %s1699_s20, 5 }
   0xf   : > { %2290 = sst [smem:[#allocation14_spill]] %s2307_s24  ;;  %p1830_p8 = por %p278_p6, %p277_p5 }
  0x10   : > { %s256_s28 = ssub.s32 %s1695_s19, %s2307_s24  ;;  %s261_s29 = sadd.s32 1, %s1679_s15 }
  0x11   : > { %s258_s30 = sor.u32 %s257_s25, %s256_s28  ;;  %p335_p10 = pnand %p1351_p7, %p334_p9 }
  0x12   : > { %p259_p11 = scmp.eq.s32.totalorder %s258_s30, 0  ;;  %s2285_s12 = sand.u32 (!%p335_p10), 1, %s1675_s14  }
  0x13   : > { %338 = sbr.rel (%p335_p10) target bundleno = 1243 (0x4db), region = 60  ;;  %p375_p12 = scmp.lt.s32.totalorder (!%p335_p10), %s1687_s17, 1 }
  0x14   : > { %s1839_s11 = scalar_select %p259_p11, %s1679_s15, %s261_s29  }
  0x15   : > { %s1845_s21 = sshll.u32 (!%p335_p10), %s2285_s12, 3  ;;  %p377_p13 = scmp.lt.s32.totalorder (!%p335_p10), %s1683_s16, 1 }
  0x16   : > { %2292 = sst [smem:[#allocation15_spill]] %s1839_s11  ;;  %s374_s18 = scalar_lea.vmem (!%p335_p10), [#allocation8], %s1845_s21 }
  0x17   : > { %p1355_p0 = scmp.ne.s32.totalorder (!%p335_p10), %s1683_s16, 0 }
  0x18   : > { %s376_s22 = scalar_select %p375_p12, %s1687_s17, 1 }
  0x19   : > { %s378_s25 = scalar_select %p377_p13, %s1683_s16, 1 }
  0x1a   : > { %s1353_s28 = sshll.u32 %s376_s22, 1  ;;  %387 = sbr.rel (%p1355_p0) target bundleno = 34 (0x22), region = 64 }
  0x1b   : > { %s380_s30 = sadd.s32 %s1353_s28, %s378_s25 }
  0x1c   : > { %s1354_s29 = sshll.u32 %s380_s30, 3 }
  0x1d   : > { %s382_s19 = scalar_lea.vmem %s2270_s0, %s1354_s29 }
  0x1f   : > { %vm388_vm0 = vcmask 523264   ;;  %v1701_v0 = vmov 0.0  }
  0x20   : > { %389 = vst.msk [vmem:[#allocation2] sm:$0xff] %vm388_vm0, %v1701_v0  ;;  %390 = vst.msk [vmem:[#allocation2 + $0x8] sm:$0xff] %vm388_vm0, %v1701_v0 }
  0x21   : > { %391 = vst.msk [vmem:[#allocation3] sm:$0xff] %vm388_vm0, %v1701_v0 }
  0x22 PF: > { %v1553_v1 = vld [vmem:[%s2271_s1 + $0x8] sm:$0xff]   ;;  %v1702_v2 = vmov 0.0   ;;  %v1554_v3 = vld [vmem:[%s2271_s1] sm:$0xff]   ;;  %vm1703_vm1 = vmmov 0   ;;  %vm410_vm2 = vcmask 261120   ;;  %v1555_v6 = vld [vmem:[%s2274_s4 + $0x18] sm:$0xff]   ;;  %v454_v10 = vlaneseq }
  0x23   : > { %1400 = vmatprep.subr.bf16.mxu1 %v1702_v2  ;;  %1420 = vmatprep.subr.mxu0 %v1702_v2  ;;  %v392_v4 = vld [vmem:[%s382_s19] sm:$0xff]  ;;  %v1556_v7 = vld [vmem:[%s2274_s4 + $0x10] sm:$0xff]   ;;  %v1557_v8 = vld [vmem:[%s2274_s4 + $0x8] sm:$0xff]   ;;  %vm523_vm3 = vcmask 523269   ;;  %vm517_vm10 = vcmask 523264   ;;  %vm620_vm11 = vcmask 1041408  }
  0x24   : > { %1401 = vmatpush3.bf16.msra.mxu1 %v1553_v1  ;;  %1404 = vmatprep.mubr.msk.bf16.mxu1 %vm1703_vm1, %v1702_v2  ;;  %v393_v5 = vpack.c.bf16 %v392_v4, %v392_v4  ;;  %v1558_v9 = vld [vmem:[%s2274_s4] sm:$0xff]   ;;  %v1887_v11 = vshrl.u32 %v454_v10, 7  ;;  %vm616_vm12 = vcmask 15360   ;;  %s1704_s24 = smov 126   ;;  %v1705_v61 = vmov 0   ;;  %s1713_s12 = smov 64  }
  0x25   : > { %1402 = vmatprep.subr.bf16.mxu1 %v1702_v2  ;;  %1422 = vmatprep.mubr.msk.f32.mxu0 %vm1703_vm1, %v1702_v2  ;;  %v1360_v14 = vld [vmem:[%s2272_s2] ss:$0 sm:$0xff]  ;;  %v1361_v21 = vld [vmem:[%s2272_s2 + $0x1] ss:$0 sm:$0xff]  ;;  %v1362_v27 = vld [vmem:[%s2272_s2 + $0x2] ss:$0 sm:$0xff] }
  0x26   : > { %vm466_vm4 = vcmp.ge.s32.totalorder %v1887_v11, 3  ;;  %vm476_vm5 = vcmp.ge.s32.totalorder %v1887_v11, 2  ;;  %v1359_v18 = vld [vmem:[%s2273_s3] ss:$0 sm:$0xff]  ;;  %vm486_vm6 = vcmp.ge.s32.totalorder %v1887_v11, 1  ;;  %vm502_vm7 = vcmp.lt.s32.totalorder %v1887_v11, 3  ;;  %1521 = vset.pattern.permute.xlu1 %v1705_v61 }
  0x27   : > { %vm507_vm8 = vcmp.lt.s32.totalorder %v1887_v11, 2  ;;  %v1363_v32 = vld [vmem:[%s2272_s2 + $0x3] ss:$0 sm:$0xff]  ;;  %vm512_vm9 = vcmp.lt.s32.totalorder %v1887_v11, 1  ;;  %v608_v56 = vld [vmem:[%s2275_s5] sm:$0x3] }
  0x28   : > { %1403 = vmatpush3.bf16.msra.mxu1 %v1554_v3  ;;  %v501_v12 = vld [vmem:[#allocation3] sm:$0xff]  ;;  %1421 = vmatpush3.msk.msra.mxu0 %vm620_vm11, %v608_v56  ;;  %v1706_v0 = vmov 4   ;;  %v1370_v1 = vld [vmem:[%s2276_s6] ss:$0 sm:$0xff]  ;;  %vm1138_vm15 = vcmask 1040384   ;;  %vm1141_vm0 = vcmask 1042432  }
  0x29   : > { %1408 = vmatprep.subr.bf16.mxu1 %v1702_v2  ;;  %v503_v23 = vrot.slane %v501_v12, 5  ;;  %v508_v24 = vrot.slane %v501_v12, 6  ;;  %v513_v35 = vrot.slane %v501_v12, 7  ;;  %1425 = vmatprep.subr.bf16.mxu0 %v1702_v2  ;;  %s1381_s22 = sshll.u32 %s1687_s17, 1  ;;  %s1269_s11 = sshll.u32 %s374_s18, 4  ;;  %s2215_s11 = int_to_ptr.vmem [resolvable:$true] %s1269_s11 }
  0x2a   : > { %s1265_s23 = sadd.s32 %s1683_s16, %s1381_s22  ;;  %s2293_s17 = sand.u32 1, %s1675_s14  }
  0x2b   : > { %1405 = vmatmul.mubr.msk.bf16.vlgmr.msra.gmra.mxu1 %vm410_vm2, %v393_v5  ;;  %v504_v33 = vsel %vm502_vm7, %v503_v23, 0.0  ;;  %v509_v34 = vsel %vm507_vm8, %v508_v24, 0.0  ;;  %v514_v42 = vsel %vm512_vm9, %v513_v35, 0.0  ;;  %s1254_s16 = scalar_lea.sflag [#allocation9], %s2293_s17  ;;  %s1607_s28 = scalar_lea.vmem %s2215_s11, 128 }
  0x2c   : > { %1416 = vmatprep.mubr.msk.bf16.mxu1 %vm1703_vm1, %v1702_v2  ;;  %1409 = vmatpush3.bf16.msra.mxu1 %v1555_v6  ;;  %v505_v40 = vmul.f32 %v1360_v14, %v504_v33  ;;  %v510_v41 = vmul.f32 %v1361_v21, %v509_v34  ;;  %v515_v45 = vmul.f32 %v1362_v27, %v514_v42  ;;  %v1710_v33 = vmov 5   ;;  %p1608_p1 = scmp.ne.s32.totalorder %s2215_s11, %s1607_s28  ;;  %s1714_s30 = smov [#allocation8]  }
  0x2d   : > { %1410 = vmatprep.subr.bf16.mxu1 %v1702_v2  ;;  %v1711_v34 = vmov 3   ;;  %v811_v42 = vsub.s32 1, %v1887_v11  ;;  %s1611_s29 = sshll.u32 %s1714_s30, 4  ;;  %s1612_s29 = int_to_ptr.vmem [resolvable:$false] %s1611_s29 }
  0x2e   : > { %v511_v44 = vadd.f32 %v510_v41, %v505_v40  ;;  %v1982_v41 = vld [vmem:[%s2277_s7] sm:$0xff]  ;;  %p1609_p2 = pnand %p1608_p1, %p1821_p3  ;;  %s1613_s22 = scalar_lea.vmem %s1612_s29, 256 }
  0x2f   : > { %p1614_p5 = scmp.lt.s32.totalorder %s2215_s11, %s1612_s29  ;;  %p1615_p6 = scmp.lt.s32.totalorder %s1613_s22, %s1607_s28 }
  0x30   : > { %1411 = vmatpush3.bf16.msra.mxu1 %v1556_v7  ;;  %v516_v46 = vadd.f32 %v515_v45, %v511_v44  ;;  %v858_v45 = vsub.s32 2, %v1887_v11  ;;  %p1610_p4 = pneg %p1609_p2 }
  0x31   : > { %1412 = vmatprep.subr.bf16.mxu1 %v1702_v2  ;;  %p1616_p7 = por %p1615_p6, %p1614_p5 }
  0x33   : > { %p1617_p9 = pnand %p1616_p7, %p1610_p4 }
  0x34   : > { %1413 = vmatpush3.bf16.msra.mxu1 %v1557_v8 }
  0x35   : > { %1414 = vmatprep.subr.bf16.mxu1 %v1702_v2 }
  0x38   : > { %1415 = vmatpush3.bf16.msra.mxu1 %v1558_v9 }
  0xeb   : > { %v1889_v13 = vpop.f32.mrf.mxu1 }
  0xec   : > { %v465_v15 = vrot.slane %v1889_v13, 5  ;;  %v475_v16 = vrot.slane %v1889_v13, 6  ;;  %v485_v17 = vrot.slane %v1889_v13, 7  ;;  %524 = vst.msk [vmem:[#allocation3] sm:$0xe0] %vm523_vm3, %v1889_v13  ;;  %v499_v39 = vmul.f32 %v1363_v32, %v1889_v13 }
  0xed   : > { %v1406_v19 = vpop.f32.mrf.mxu1  ;;  %vm1145_vm3 = vcmask 1044480  }
  0xee   : > { %v467_v20 = vsel %vm466_vm4, %v465_v15, 0.0  ;;  %v477_v22 = vsel %vm476_vm5, %v475_v16, 0.0  ;;  %v487_v28 = vsel %vm486_vm6, %v485_v17, 0.0  ;;  %v1374_v16 = vmul.f32 -1.442695, %v1889_v13 }
  0xef   : > { %v472_v25 = vmul.f32 %v1360_v14, %v467_v20  ;;  %v451_v26 = vpop.f32.mrf.mxu1  ;;  %v482_v30 = vmul.f32 %v1361_v21, %v477_v22  ;;  %v492_v37 = vmul.f32 %v1362_v27, %v487_v28  ;;  %vm1147_vm4 = vcmask 1045504  }
  0xf0   : > { %vm1149_vm5 = vcmask 1046528  }
  0xf1   : > { %v473_v29 = vadd.f32 %v1359_v18, %v472_v25  ;;  %v1407_v31 = vpop.f32.mrf.mxu1 }
  0xf2   : > { %v1709_v31 = vmov 2  }
  0xf3   : > { %v483_v36 = vadd.f32 %v482_v30, %v473_v29  ;;  %v1707_v29 = vmov 1   ;;  %v1708_v30 = vmov 7  }
  0xf5   : > { %v493_v38 = vadd.f32 %v492_v37, %v483_v36  ;;  %v1712_v37 = vmov 6  }
  0xf7   : > { %v500_v43 = vadd.f32 %v499_v39, %v493_v38 }
  0xf9   : > { %518 = vst.msk [vmem:[#allocation4] sm:$0xff] %vm517_vm10, %v500_v43 }
 0x100   : > { %v519_v47 = vld [vmem:[#allocation4] sm:$0xff] }
 0x101   : > { %v520_v48 = vadd.f32 %v519_v47, %v516_v46 }
 0x103   : > { %521 = vst.msk [vmem:[#allocation4] sm:$0xff] %vm517_vm10, %v520_v48 }
 0x10a   : > { %v522_v49 = vld [vmem:[#allocation4] sm:$0xff] }
 0x10b   : > { %v1364_v50 = vmul.f32 -1.442695, %v522_v49 }
 0x10d   : > { %1563 = vpow2.f32 %v1364_v50 }
 0x11a   : > { %v1564_v51 = vpop.eup %1563 }
 0x11b   : > { %v528_v52 = vadd.f32 1.0, %v1564_v51 }
 0x11d   : > { %1565 = vrcp.f32 %v528_v52 }
 0x12a   : > { %v1566_v53 = vpop.eup %1565 }
 0x12b   : > { %v1919_v54 = vmul.f32 %v1566_v53, %v522_v49  ;;  %v905_v49 = vsub.s32 3, %v1887_v11  ;;  %v952_v53 = vsub.s32 4, %v1887_v11 }
 0x12d   : > { %v532_v55 = vpack.c.bf16 %v1919_v54, %v1919_v54 }
 0x12f   : > { %1417 = vmatmul.mubr.msk.bf16.vlgmr.msra.gmra.mxu1 %vm517_vm10, %v532_v55 }
 0x1ef   : > { %v602_v57 = vpop.f32.mrf.mxu1 }
 0x1f0   : > { %715 = vrot.lane.b32.xlu0 %v602_v57, %s1704_s24  ;;  %1423 = vmatmul.mubr.msk.f32.vlgmr.msra.gmra.mxu0 %vm616_vm12, %v602_v57  ;;  %s1382_s24 = sshll.u32 %s1265_s23, 7 }
 0x1f1   : > { %v1418_v58 = vpop.f32.mrf.mxu1  ;;  %1433 = vmatprep.mubr.msk.bf16.mxu0 %vm1703_vm1, %v1702_v2  ;;  %vm1143_vm1 = vcmask 1043456   ;;  %s2213_s25 = scalar_lea.hbm %s2280_s10, %s1382_s24 }
 0x1f2   : > { %v999_v58 = vsub.s32 5, %v1887_v11 }
 0x1f3   : > { %v605_v59 = vpop.f32.mrf.mxu1 }
 0x1f5   : > { %v1419_v60 = vpop.f32.mrf.mxu1 }
 0x262   : > { %v716_v62 = vpop.permute.xlu0 %715 }
 0x263   : > { %718 = vst.msk [vmem:[#allocation6] sm:$0xff] %vm410_vm2, %v716_v62  ;;  %v721_v62 = vld [vmem:[#allocation2] sm:$0xff] }
 0x26a   : > { %v725_v63 = vld [vmem:[#allocation6] sm:$0xff] }
 0x26b   : > { %726 = vxpose.xlu0.b32.start.end [1/1] (short) (narrow) %v725_v63, 32 }
 0x294   : > { %1533 = vset.pattern.permute.xlu0 %v1706_v0 }
 0x2b0   : > { %v690_v3 = vpop.f32.mrf.mxu0 }
 0x2b1   : > { %v691_v4 = vadd.f32 %v1370_v1, %v690_v3 }
 0x2b2   : > { %v1424_v5 = vpop.f32.mrf.mxu0 }
 0x2b3   : > { %v697_v6 = vand.u32 2147483647, %v691_v4  ;;  %v694_v20 = vmax.f32 %v691_v4, 0.0  ;;  %vm695_vm14 = vcmp.ne.f32.partialorder %v691_v4, %v691_v4 }
 0x2b5   : > { %v698_v7 = vsub.f32 0.0, %v697_v6 }
 0x2b7   : > { %v699_v8 = vmul.f32 1.442695, %v698_v7 }
 0x2b9   : > { %1567 = vpow2.f32 %v699_v8 }
 0x2c6   : > { %v1568_v9 = vpop.eup %1567 }
 0x2c7   : > { %v701_v10 = vadd.f32 1.0, %v1568_v9  ;;  %v704_v12 = vmul.f32 -0.5, %v1568_v9  ;;  %v707_v15 = vand.u32 2147483647, %v1568_v9 }
 0x2c9   : > { %1569 = vlog2.f32 %v701_v10  ;;  %v705_v14 = vadd.f32 1.0, %v704_v12  ;;  %vm708_vm13 = vcmp.lt.f32.partialorder %v707_v15, 0.0004427343 }
 0x2ca   : > { %1571 = vpow2.f32 %v1374_v16 }
 0x2cb   : > { %v706_v19 = vmul.f32 %v1568_v9, %v705_v14 }
 0x2d6   : > { %v1570_v17 = vpop.eup %1569 }
 0x2d7   : > { %v703_v18 = vmul.f32 0.6931472, %v1570_v17  ;;  %v1572_v25 = vpop.eup %1571  ;;  %v1093_v17 = vsub.s32 7, %v1887_v11 }
 0x2d8   : > { %v1167_v27 = vadd.f32 1.0, %v1572_v25 }
 0x2d9   : > { %v709_v21 = vsel %vm708_vm13, %v706_v19, %v703_v18 }
 0x2da   : > { %v710_v22 = vadd.f32 %v709_v21, %v694_v20  ;;  %1573 = vrcp.f32 %v1167_v27 }
 0x2dc   : > { %v711_v23 = vsel %vm695_vm14, %v691_v4, %v710_v22  ;;  %v1046_v4 = vsub.s32 6, %v1887_v11 }
 0x2dd   : > { %712 = vst.msk [vmem:[#allocation4] sm:$0xff] %vm517_vm10, %v711_v23  ;;  %v713_v24 = vmul.f32 %v711_v23, %v1919_v54 }
 0x2df   : > { %714 = vst.msk [vmem:[#allocation5] sm:$0xff] %vm517_vm10, %v713_v24 }
 0x2e4   : > { %v1973_v39 = vld [vmem:[#allocation4] sm:$0xff] }
 0x2e5   : > { %v1990_v44 = vrot.slane %v1973_v39, %v811_v42  ;;  %v1998_v48 = vrot.slane %v1973_v39, %v858_v45  ;;  %v2006_v52 = vrot.slane %v1973_v39, %v905_v49  ;;  %v2016_v57 = vrot.slane %v1973_v39, %v952_v53 }
 0x2e6   : > { %v2020_v59 = vld [vmem:[#allocation5] sm:$0xff]  ;;  %v2031_v3 = vrot.slane %v1973_v39, %v999_v58  ;;  %v2047_v14 = vrot.slane %v1973_v39, %v1046_v4  ;;  %v2061_v23 = vrot.slane %v1973_v39, %v1093_v17 }
 0x2e7   : > { %v742_v26 = vpop.trf.xlu0  ;;  %v1574_v36 = vpop.eup %1573  ;;  %v813_v47 = vmul.f32 %v1990_v44, %v1982_v41  ;;  %v860_v51 = vmul.f32 %v1998_v48, %v1982_v41  ;;  %v907_v56 = vmul.f32 %v2006_v52, %v1982_v41  ;;  %v954_v63 = vmul.f32 %v2016_v57, %v1982_v41 }
 0x2e8   : > { %776 = vperm.xlu1 %1521, %v742_v26   ;;  %v1170_v38 = vmul.f32 %v1574_v36, %v1889_v13  ;;  %v760_v13 = vsub.s32 0, %v1887_v11  ;;  %v1001_v9 = vmul.f32 %v2031_v3, %v1982_v41  ;;  %v2042_v12 = vrot.slane %v2020_v59, %v811_v42 }
 0x2e9   : > { %v815_v50 = vmul.f32 1.442695, %v813_v47  ;;  %v862_v55 = vmul.f32 1.442695, %v860_v51  ;;  %v909_v60 = vmul.f32 1.442695, %v907_v56  ;;  %v1048_v21 = vmul.f32 %v2047_v14, %v1982_v41 }
 0x2ea   : > { %v1977_v40 = vrot.slane %v1973_v39, %v760_v13  ;;  %v2026_v1 = vrot.slane %v2020_v59, %v760_v13  ;;  %v956_v7 = vmul.f32 1.442695, %v954_v63  ;;  %v1003_v19 = vmul.f32 1.442695, %v1001_v9 }
 0x2eb   : > { %v743_v28 = vpop.trf.xlu0  ;;  %v2064_v24 = vrot.slane %v2020_v59, %v858_v45  ;;  %v2119_v63 = vrot.slane %v2020_v59, %v1046_v4 }
 0x2ec   : > { %1522 = vset.pattern.permute.xlu1 %v1707_v29  ;;  %971 = vperm.xlu0 %1533, %v743_v28   ;;  %v762_v43 = vmul.f32 %v1977_v40, %v1982_v41 }
 0x2ed   : > { %826 = vperm.xlu1 %1522, %v742_v26  }
 0x2ee   : > { %v764_v46 = vmul.f32 1.442695, %v762_v43 }
 0x2ef   : > { %v1944_v32 = vpop.trf.xlu0 }
 0x2f0   : > { %1536 = vset.pattern.permute.xlu0 %v1708_v30  ;;  %1575 = vpow2.f32 %v764_v46 }
 0x2f1   : > { %1523 = vset.pattern.permute.xlu1 %v1709_v31  ;;  %1112 = vperm.xlu0 %1536, %v743_v28   ;;  %1577 = vpow2.f32 %v815_v50  ;;  %v2101_v50 = vrot.slane %v2020_v59, %v999_v58 }
 0x2f2   : > { %873 = vperm.xlu1 %1523, %v742_v26   ;;  %1579 = vpow2.f32 %v862_v55  ;;  %v1559_v55 = vld [vmem:[%s2279_s9 + $0x18] sm:$0xff]  }
 0x2f3   : > { %v1949_v35 = vpop.trf.xlu0  ;;  %1581 = vpow2.f32 %v909_v60  ;;  %1426 = vmatpush3.bf16.msra.mxu0 %v1559_v55 }
 0x2f4   : > { %1583 = vpow2.f32 %v956_v7  ;;  %1427 = vmatprep.subr.bf16.mxu0 %v1702_v2 }
 0x2f5   : > { %1542 = vset.pattern.permute.xlu0 %v1710_v33  ;;  %1585 = vpow2.f32 %v1003_v19  ;;  %v1562_v19 = vld [vmem:[%s2279_s9] sm:$0xff]  }
 0x2f6   : > { %1524 = vset.pattern.permute.xlu1 %v1711_v34  ;;  %1026 = vperm.xlu0 %1542, %v1944_v32  }
 0x2f7   : > { %920 = vperm.xlu1 %1524, %v742_v26  }
 0x2fa   : > { %1550 = vset.pattern.permute.xlu0 %v1712_v37 }
 0x2fb   : > { %1525 = vset.pattern.permute.xlu1 %v1706_v0  ;;  %1077 = vperm.xlu0 %1550, %v1949_v35  }
 0x2fc   : > { %967 = vperm.xlu1 %1525, %v742_v26  }
 0x2ff   : > { %1172 = vrot.lane.b32.xlu0 %v1170_v38, %s1713_s12 }
 0x300   : > { %1526 = vset.pattern.permute.xlu1 %v1710_v33  ;;  %1552 = vset.pattern.permute.xlu0 %v1708_v30 }
 0x301   : > { %1014 = vperm.xlu1 %1526, %v742_v26  }
 0x305   : > { %1527 = vset.pattern.permute.xlu1 %v1712_v37 }
 0x306   : > { %1061 = vperm.xlu1 %1527, %v742_v26  }
 0x30a   : > { %1528 = vset.pattern.permute.xlu1 %v1708_v30 }
 0x30b   : > { %1108 = vperm.xlu1 %1528, %v742_v26  }
 0x30f   : > { %1529 = vset.pattern.permute.xlu1 %v1705_v61 }
 0x310   : > { %781 = vperm.xlu1 %1529, %v743_v28  }
 0x314   : > { %1530 = vset.pattern.permute.xlu1 %v1707_v29 }
 0x315   : > { %830 = vperm.xlu1 %1530, %v743_v28  }
 0x319   : > { %1531 = vset.pattern.permute.xlu1 %v1709_v31 }
 0x31a   : > { %877 = vperm.xlu1 %1531, %v743_v28  }
 0x31e   : > { %1532 = vset.pattern.permute.xlu1 %v1711_v34 }
 0x31f   : > { %924 = vperm.xlu1 %1532, %v743_v28  }
 0x323   : > { %1534 = vset.pattern.permute.xlu1 %v1710_v33 }
 0x324   : > { %1018 = vperm.xlu1 %1534, %v743_v28  }
 0x328   : > { %1535 = vset.pattern.permute.xlu1 %v1712_v37 }
 0x329   : > { %1065 = vperm.xlu1 %1535, %v743_v28   ;;  %v1050_v28 = vmul.f32 1.442695, %v1048_v21 }
 0x32b   : > { %1587 = vpow2.f32 %v1050_v28 }
 0x32d   : > { %1537 = vset.pattern.permute.xlu1 %v1705_v61 }
 0x32e   : > { %790 = vperm.xlu1 %1537, %v1944_v32  }
 0x332   : > { %1538 = vset.pattern.permute.xlu1 %v1707_v29 }
 0x333   : > { %838 = vperm.xlu1 %1538, %v1944_v32  }
 0x337   : > { %1539 = vset.pattern.permute.xlu1 %v1709_v31 }
 0x338   : > { %885 = vperm.xlu1 %1539, %v1944_v32  }
 0x33c   : > { %1540 = vset.pattern.permute.xlu1 %v1711_v34 }
 0x33d   : > { %932 = vperm.xlu1 %1540, %v1944_v32  }
 0x341   : > { %1541 = vset.pattern.permute.xlu1 %v1706_v0 }
 0x342   : > { %979 = vperm.xlu1 %1541, %v1944_v32  }
 0x346   : > { %1543 = vset.pattern.permute.xlu1 %v1712_v37 }
 0x347   : > { %1073 = vperm.xlu1 %1543, %v1944_v32  }
 0x34b   : > { %1544 = vset.pattern.permute.xlu1 %v1705_v61  ;;  %v1576_v61 = vpop.eup %1575 }
 0x34c   : > { %795 = vperm.xlu1 %1544, %v1949_v35   ;;  %v768_v5 = vmul.f32 %v1576_v61, %v721_v62  ;;  %v1578_v10 = vpop.eup %1577 }
 0x34d   : > { %v1580_v22 = vpop.eup %1579 }
 0x350   : > { %1545 = vset.pattern.permute.xlu1 %v1707_v29  ;;  %v1095_v29 = vmul.f32 %v2061_v23, %v1982_v41  ;;  %v2090_v41 = vrot.slane %v2020_v59, %v952_v53 }
 0x351   : > { %842 = vperm.xlu1 %1545, %v1949_v35  }
 0x352   : > { %v1097_v38 = vmul.f32 1.442695, %v1095_v29 }
 0x354   : > { %1589 = vpow2.f32 %v1097_v38 }
 0x355   : > { %1546 = vset.pattern.permute.xlu1 %v1709_v31  ;;  %v1582_v31 = vpop.eup %1581 }
 0x356   : > { %889 = vperm.xlu1 %1546, %v1949_v35   ;;  %v1584_v39 = vpop.eup %1583 }
 0x35a   : > { %1547 = vset.pattern.permute.xlu1 %v1711_v34 }
 0x35b   : > { %936 = vperm.xlu1 %1547, %v1949_v35  }
 0x35f   : > { %1548 = vset.pattern.permute.xlu1 %v1706_v0 }
 0x360   : > { %983 = vperm.xlu1 %1548, %v1949_v35  }
 0x363   : > { %v777_v0 = vpop.permute.xlu1 %776 }
 0x364   : > { %v784_v6 = vmul.f32 %v777_v0, %v2026_v1  ;;  %1549 = vset.pattern.permute.xlu1 %v1710_v33  ;;  %v2079_v33 = vrot.slane %v2020_v59, %v905_v49  ;;  %v1586_v49 = vpop.eup %1585 }
 0x365   : > { %1030 = vperm.xlu1 %1549, %v1949_v35   ;;  %v1588_v62 = vpop.eup %1587 }
 0x366   : > { %v2037_v8 = vadd.f32 %v784_v6, %v768_v5  ;;  %v1590_v4 = vpop.eup %1589 }
 0x368   : > { %v827_v15 = vpop.permute.xlu1 %826  ;;  %v819_v16 = vmul.f32 %v1578_v10, %v2037_v8 }
 0x369   : > { %v833_v18 = vmul.f32 %v827_v15, %v2042_v12  ;;  %1551 = vset.pattern.permute.xlu1 %v1708_v30  ;;  %v2134_v15 = vrot.slane %v2020_v59, %v1093_v17  ;;  %v722_v59 = vld [vmem:[#allocation2 + $0x8] sm:$0xff] }
 0x36a   : > { %1120 = vperm.xlu1 %1551, %v1944_v32   ;;  %v2076_v32 = vld [vmem:[%s2277_s7 + $0x8] sm:$0xff] }
 0x36b   : > { %v2054_v20 = vadd.f32 %v833_v18, %v819_v16  ;;  %v763_v37 = vmul.f32 %v1977_v40, %v2076_v32  ;;  %v814_v47 = vmul.f32 %v1990_v44, %v2076_v32  ;;  %v1560_v44 = vld [vmem:[%s2279_s9 + $0x10] sm:$0xff]   ;;  %v861_v58 = vmul.f32 %v1998_v48, %v2076_v32  ;;  %v1561_v48 = vld [vmem:[%s2279_s9 + $0x8] sm:$0xff]  }
 0x36c   : > { %1428 = vmatpush3.bf16.msra.mxu0 %v1560_v44  ;;  %v908_v9 = vmul.f32 %v2006_v52, %v2076_v32  ;;  %v955_v11 = vmul.f32 %v2016_v57, %v2076_v32 }
 0x36d   : > { %v874_v25 = vpop.permute.xlu1 %873  ;;  %v866_v26 = vmul.f32 %v1580_v22, %v2054_v20  ;;  %v766_v45 = vmul.f32 1.442695, %v763_v37  ;;  %v817_v60 = vmul.f32 1.442695, %v814_v47  ;;  %v864_v7 = vmul.f32 1.442695, %v861_v58  ;;  %1429 = vmatprep.subr.bf16.mxu0 %v1702_v2 }
 0x36e   : > { %v880_v27 = vmul.f32 %v874_v25, %v2064_v24  ;;  %1124 = vperm.xlu1 %1551, %v1949_v35   ;;  %v911_v52 = vmul.f32 1.442695, %v908_v9  ;;  %v958_v28 = vmul.f32 1.442695, %v955_v11 }
 0x36f   : > { %1591 = vpow2.f32 %v766_v45 }
 0x370   : > { %v2071_v30 = vadd.f32 %v880_v27, %v866_v26  ;;  %1593 = vpow2.f32 %v817_v60  ;;  %1430 = vmatpush3.bf16.msra.mxu0 %v1561_v48 }
 0x371   : > { %1595 = vpow2.f32 %v864_v7  ;;  %1431 = vmatprep.subr.bf16.mxu0 %v1702_v2  ;;  %v1002_v2 = vmul.f32 %v2031_v3, %v2076_v32 }
 0x372   : > { %v921_v34 = vpop.permute.xlu1 %920  ;;  %v913_v36 = vmul.f32 %v1582_v31, %v2071_v30  ;;  %1597 = vpow2.f32 %v911_v52 }
 0x373   : > { %v927_v35 = vmul.f32 %v921_v34, %v2079_v33  ;;  %1599 = vpow2.f32 %v958_v28 }
 0x374   : > { %1432 = vmatpush3.bf16.msra.mxu0 %v1562_v19 }
 0x375   : > { %v2085_v13 = vadd.f32 %v927_v35, %v913_v36  ;;  %v1005_v36 = vmul.f32 1.442695, %v1002_v2  ;;  %v1049_v35 = vmul.f32 %v2047_v14, %v2076_v32 }
 0x377   : > { %v968_v42 = vpop.permute.xlu1 %967  ;;  %v960_v43 = vmul.f32 %v1584_v39, %v2085_v13  ;;  %1601 = vpow2.f32 %v1005_v36 }
 0x378   : > { %v974_v46 = vmul.f32 %v968_v42, %v2090_v41  ;;  %v1052_v42 = vmul.f32 1.442695, %v1049_v35 }
 0x37a   : > { %v2096_v40 = vadd.f32 %v974_v46, %v960_v43  ;;  %1603 = vpow2.f32 %v1052_v42 }
 0x37c   : > { %v1015_v51 = vpop.permute.xlu1 %1014  ;;  %v1007_v53 = vmul.f32 %v1586_v49, %v2096_v40  ;;  %v1592_v22 = vpop.eup %1591 }
 0x37d   : > { %v1021_v56 = vmul.f32 %v1015_v51, %v2101_v50  ;;  %v769_v26 = vmul.f32 %v1592_v22, %v722_v59  ;;  %v1594_v31 = vpop.eup %1593 }
 0x37e   : > { %v1596_v39 = vpop.eup %1595 }
 0x37f   : > { %v2113_v61 = vadd.f32 %v1021_v56, %v1007_v53  ;;  %v1598_v47 = vpop.eup %1597 }
 0x380   : > { %v1600_v56 = vpop.eup %1599 }
 0x381   : > { %v1062_v0 = vpop.permute.xlu1 %1061  ;;  %v1054_v5 = vmul.f32 %v1588_v62, %v2113_v61 }
 0x382   : > { %v1068_v6 = vmul.f32 %v1062_v0, %v2119_v63 }
 0x384   : > { %v2129_v10 = vadd.f32 %v1068_v6, %v1054_v5  ;;  %v1602_v58 = vpop.eup %1601 }
 0x386   : > { %v1109_v16 = vpop.permute.xlu1 %1108  ;;  %v1101_v18 = vmul.f32 %v1590_v4, %v2129_v10 }
 0x387   : > { %v1115_v21 = vmul.f32 %v1109_v16, %v2134_v15  ;;  %v1604_v6 = vpop.eup %1603 }
 0x389   : > { %v2144_v17 = vadd.f32 %v1115_v21, %v1101_v18 }
 0x38b   : > { %v782_v25 = vpop.permute.xlu1 %781  ;;  %1152 = vst.msk [vmem:[#allocation2] sm:$0xff] %vm517_vm10, %v2144_v17 }
 0x38c   : > { %v785_v27 = vmul.f32 %v782_v25, %v2026_v1  ;;  %v1096_v1 = vmul.f32 %v2061_v23, %v2076_v32 }
 0x38e   : > { %v787_v29 = vadd.f32 %v785_v27, %v769_v26  ;;  %v1099_v49 = vmul.f32 1.442695, %v1096_v1 }
 0x390   : > { %v831_v34 = vpop.permute.xlu1 %830  ;;  %v820_v57 = vmul.f32 %v1594_v31, %v787_v29  ;;  %1605 = vpow2.f32 %v1099_v49 }
 0x391   : > { %v834_v37 = vmul.f32 %v831_v34, %v2042_v12  ;;  %v972_v12 = vpop.permute.xlu0 %971 }
 0x392   : > { %v975_v23 = vmul.f32 %v972_v12, %v2090_v41 }
 0x393   : > { %v836_v38 = vadd.f32 %v834_v37, %v820_v57 }
 0x395   : > { %v878_v43 = vpop.permute.xlu1 %877  ;;  %v867_v3 = vmul.f32 %v1596_v39, %v836_v38  ;;  %v1113_v7 = vpop.permute.xlu0 %1112 }
 0x396   : > { %v881_v45 = vmul.f32 %v878_v43, %v2064_v24  ;;  %v1116_v16 = vmul.f32 %v1113_v7, %v2134_v15 }
 0x398   : > { %v883_v46 = vadd.f32 %v881_v45, %v867_v3 }
 0x399   : > { %v1027_v2 = vpop.permute.xlu0 %1026 }
 0x39a   : > { %v925_v51 = vpop.permute.xlu1 %924  ;;  %v914_v53 = vmul.f32 %v1598_v47, %v883_v46 }
 0x39b   : > { %v928_v14 = vmul.f32 %v925_v51, %v2079_v33 }
 0x39d   : > { %v930_v55 = vadd.f32 %v928_v14, %v914_v53  ;;  %v1606_v4 = vpop.eup %1605  ;;  %v1078_v42 = vpop.permute.xlu0 %1077 }
 0x39f   : > { %v961_v32 = vmul.f32 %v1600_v56, %v930_v55  ;;  %v1019_v60 = vpop.permute.xlu1 %1018 }
 0x3a0   : > { %v1022_v62 = vmul.f32 %v1019_v60, %v2101_v50 }
 0x3a1   : > { %v2159_v44 = vadd.f32 %v975_v23, %v961_v32 }
 0x3a3   : > { %v1008_v24 = vmul.f32 %v1602_v58, %v2159_v44 }
 0x3a4   : > { %v1066_v0 = vpop.permute.xlu1 %1065 }
 0x3a5   : > { %v2163_v5 = vadd.f32 %v1022_v62, %v1008_v24  ;;  %v1069_v48 = vmul.f32 %v1066_v0, %v2119_v63 }
 0x3a7   : > { %v1055_v33 = vmul.f32 %v1604_v6, %v2163_v5 }
 0x3a9   : > { %v1071_v9 = vadd.f32 %v1069_v48, %v1055_v33  ;;  %v791_v41 = vpop.permute.xlu1 %790 }
 0x3aa   : > { %v798_v59 = vmul.f32 %v791_v41, %v2037_v8 }
 0x3ab   : > { %v1102_v18 = vmul.f32 %v1606_v4, %v1071_v9  ;;  %v1081_v45 = vmul.f32 %v1078_v42, %v1071_v9 }
 0x3ac   : > { %v800_v26 = vsel %vm517_vm10, %v798_v59, 0.0 }
 0x3ad   : > { %v2168_v19 = vadd.f32 %v1116_v16, %v1102_v18 }
 0x3ae   : > { %v839_v21 = vpop.permute.xlu1 %838 }
 0x3af   : > { %1153 = vst.msk [vmem:[#allocation2 + $0x8] sm:$0xff] %vm517_vm10, %v2168_v19  ;;  %v845_v15 = vmul.f32 %v839_v21, %v2054_v20 }
 0x3b1   : > { %v847_v36 = vsel %vm517_vm10, %v845_v15, 0.0 }
 0x3b3   : > { %v886_v50 = vpop.permute.xlu1 %885 }
 0x3b4   : > { %v892_v8 = vmul.f32 %v886_v50, %v2071_v30 }
 0x3b6   : > { %v894_v47 = vsel %vm517_vm10, %v892_v8, 0.0 }
 0x3b8   : > { %v933_v52 = vpop.permute.xlu1 %932 }
 0x3b9   : > { %v939_v53 = vmul.f32 %v933_v52, %v2085_v13 }
 0x3bb   : > { %v941_v58 = vsel %vm517_vm10, %v939_v53, 0.0 }
 0x3bd   : > { %v980_v22 = vpop.permute.xlu1 %979 }
 0x3be   : > { %v986_v6 = vmul.f32 %v980_v22, %v2096_v40  ;;  %v1033_v40 = vmul.f32 %v1027_v2, %v2113_v61 }
 0x3c0   : > { %v988_v21 = vsel %vm517_vm10, %v986_v6, 0.0 }
 0x3c2   : > { %v1074_v11 = vpop.permute.xlu1 %1073 }
 0x3c3   : > { %v1080_v43 = vmul.f32 %v1074_v11, %v2129_v10  ;;  %v1083_v10 = vsel %vm517_vm10, %v1081_v45, 0.0 }
 0x3c5   : > { %v1082_v30 = vsel %vm517_vm10, %v1080_v43, 0.0 }
 0x3c6   : > { %v1084_v24 = vadd.f32 %v1083_v10, %v1082_v30 }
 0x3c7   : > { %v796_v63 = vpop.permute.xlu1 %795 }
 0x3c8   : > { %v799_v25 = vmul.f32 %v796_v63, %v787_v29  ;;  %v1085_v16 = vrot.slane %v1084_v24, 4 }
 0x3ca   : > { %v801_v27 = vsel %vm517_vm10, %v799_v25, 0.0 }
 0x3cb   : > { %v802_v28 = vadd.f32 %v801_v27, %v800_v26  ;;  %v1086_v26 = vadd.f32 %v1085_v16, %v1084_v24 }
 0x3cc   : > { %v843_v31 = vpop.permute.xlu1 %842 }
 0x3cd   : > { %v803_v34 = vrot.slane %v802_v28, 4  ;;  %v846_v57 = vmul.f32 %v843_v31, %v836_v38  ;;  %v1087_v61 = vrot.slane %v1086_v26, 2 }
 0x3cf   : > { %v804_v35 = vadd.f32 %v803_v34, %v802_v28  ;;  %v848_v37 = vsel %vm517_vm10, %v846_v57, 0.0  ;;  %v1035_v57 = vsel %vm517_vm10, %v1033_v40, 0.0 }
 0x3d0   : > { %v849_v39 = vadd.f32 %v848_v37, %v847_v36 }
 0x3d1   : > { %v805_v29 = vrot.slane %v804_v35, 2  ;;  %v890_v1 = vpop.permute.xlu1 %889 }
 0x3d2   : > { %v850_v3 = vrot.slane %v849_v39, 4  ;;  %v893_v20 = vmul.f32 %v890_v1, %v883_v46 }
 0x3d3   : > { %v806_v49 = vadd.f32 %v805_v29, %v804_v35 }
 0x3d4   : > { %v851_v38 = vadd.f32 %v850_v3, %v849_v39  ;;  %v895_v51 = vsel %vm517_vm10, %v893_v20, 0.0  ;;  %v1088_v3 = vadd.f32 %v1087_v61, %v1086_v26 }
 0x3d5   : > { %v896_v14 = vadd.f32 %v895_v51, %v894_v47  ;;  %v807_v60 = vrot.slane %v806_v49, 1 }
 0x3d6   : > { %v852_v12 = vrot.slane %v851_v38, 2  ;;  %v937_v56 = vpop.permute.xlu1 %936  ;;  %v1089_v30 = vrot.slane %v1088_v3, 1 }
 0x3d7   : > { %v897_v23 = vrot.slane %v896_v14, 4  ;;  %v940_v32 = vmul.f32 %v937_v56, %v930_v55  ;;  %v808_v9 = vadd.f32 %v807_v60, %v806_v49 }
 0x3d8   : > { %v853_v46 = vadd.f32 %v852_v12, %v851_v38  ;;  %v1090_v10 = vadd.f32 %v1089_v30, %v1088_v3 }
 0x3d9   : > { %v898_v62 = vadd.f32 %v897_v23, %v896_v14  ;;  %v942_v0 = vsel %vm517_vm10, %v940_v32, 0.0 }
 0x3da   : > { %v854_v13 = vrot.slane %v853_v46, 1  ;;  %v943_v33 = vadd.f32 %v942_v0, %v941_v58 }
 0x3db   : > { %v899_v48 = vrot.slane %v898_v62, 2  ;;  %v984_v7 = vpop.permute.xlu1 %983 }
 0x3dc   : > { %v855_v41 = vadd.f32 %v854_v13, %v853_v46  ;;  %v944_v55 = vrot.slane %v943_v33, 4  ;;  %v987_v4 = vmul.f32 %v984_v7, %v2159_v44  ;;  %v1373_v13 = vld [vmem:[%s2278_s8] ss:$0 sm:$0xff] }
 0x3dd   : > { %v900_v18 = vadd.f32 %v899_v48, %v898_v62 }
 0x3de   : > { %v1139_v50 = vsel %vm1138_vm15, %v808_v9, %v855_v41  ;;  %v945_v52 = vadd.f32 %v944_v55, %v943_v33  ;;  %v989_v11 = vsel %vm517_vm10, %v987_v4, 0.0  ;;  %v1162_v33 = vmul.f32 %v1373_v13, %v1919_v54  ;;  %v1173_v9 = vpop.permute.xlu0 %1172 }
 0x3df   : > { %v901_v22 = vrot.slane %v900_v18, 1  ;;  %v990_v59 = vadd.f32 %v989_v11, %v988_v21 }
 0x3e0   : > { %v946_v63 = vrot.slane %v945_v52, 2  ;;  %v1031_v25 = vpop.permute.xlu1 %1030 }
 0x3e1   : > { %v902_v27 = vadd.f32 %v901_v22, %v900_v18  ;;  %v991_v15 = vrot.slane %v990_v59, 4  ;;  %v1034_v28 = vmul.f32 %v1031_v25, %v2163_v5 }
 0x3e2   : > { %v947_v44 = vadd.f32 %v946_v63, %v945_v52 }
 0x3e3   : > { %v1140_v31 = vsel %vm620_vm11, %v1139_v50, %v902_v27  ;;  %v992_v34 = vadd.f32 %v991_v15, %v990_v59  ;;  %v1036_v36 = vsel %vm517_vm10, %v1034_v28, 0.0 }
 0x3e4   : > { %v948_v35 = vrot.slane %v947_v44, 1  ;;  %v1037_v37 = vadd.f32 %v1036_v36, %v1035_v57 }
 0x3e5   : > { %v993_v2 = vrot.slane %v992_v34, 2  ;;  %v1121_v8 = vpop.permute.xlu1 %1120 }
 0x3e6   : > { %v949_v39 = vadd.f32 %v948_v35, %v947_v44  ;;  %v1038_v29 = vrot.slane %v1037_v37, 4  ;;  %v1127_v5 = vmul.f32 %v1121_v8, %v2144_v17 }
 0x3e7   : > { %v994_v1 = vadd.f32 %v993_v2, %v992_v34 }
 0x3e8   : > { %v1142_v42 = vsel %vm1141_vm0, %v1140_v31, %v949_v39  ;;  %v1039_v43 = vadd.f32 %v1038_v29, %v1037_v37  ;;  %v1129_v53 = vsel %vm517_vm10, %v1127_v5, 0.0 }
 0x3e9   : > { %v995_v20 = vrot.slane %v994_v1, 1  ;;  %v1125_v45 = vpop.permute.xlu1 %1124 }
 0x3ea   : > { %v1040_v47 = vrot.slane %v1039_v43, 2  ;;  %v1128_v49 = vmul.f32 %v1125_v45, %v2168_v19 }
 0x3eb   : > { %v996_v38 = vadd.f32 %v995_v20, %v994_v1 }
 0x3ec   : > { %v1041_v51 = vadd.f32 %v1040_v47, %v1039_v43  ;;  %v1130_v14 = vsel %vm517_vm10, %v1128_v49, 0.0 }
 0x3ed   : > { %v1144_v12 = vsel %vm1143_vm1, %v1142_v42, %v996_v38  ;;  %v1131_v56 = vadd.f32 %v1130_v14, %v1129_v53 }
 0x3ee   : > { %v1042_v23 = vrot.slane %v1041_v51, 1 }
 0x3ef   : > { %v1132_v32 = vrot.slane %v1131_v56, 4 }
 0x3f0   : > { %v1043_v17 = vadd.f32 %v1042_v23, %v1041_v51 }
 0x3f1   : > { %v1133_v60 = vadd.f32 %v1132_v32, %v1131_v56 }
 0x3f2   : > { %v1146_v46 = vsel %vm1145_vm3, %v1144_v12, %v1043_v17 }
 0x3f3   : > { %v1134_v58 = vrot.slane %v1133_v60, 2  ;;  %v1148_v19 = vsel %vm1147_vm4, %v1146_v46, %v1090_v10 }
 0x3f5   : > { %v1135_v24 = vadd.f32 %v1134_v58, %v1133_v60 }
 0x3f7   : > { %v1136_v62 = vrot.slane %v1135_v24, 1 }
 0x3f9   : > { %v1137_v0 = vadd.f32 %v1136_v62, %v1135_v24 }
 0x3fb   : > { %v1150_v6 = vsel %vm1149_vm5, %v1148_v19, %v1137_v0 }
 0x3fc   : > { %1151 = vst.msk [vmem:[#allocation7] sm:$0xff] %vm517_vm10, %v1150_v6 }
 0x403   : > { %v1154_v48 = vld [vmem:[#allocation7] sm:$0xff] }
 0x404   : > { %v1163_v7 = vadd.f32 %v1162_v33, %v1154_v48 }
 0x406   : > { %v1175_v41 = vmul.f32 %v1173_v9, %v1163_v7 }
 0x408   : > { %v1176_v55 = vpack.c.bf16 %v1175_v41, %v1175_v41 }
 0x40a   : > { %1434 = vmatmul.mubr.msk.bf16.vlgmr.msra.gmra.mxu0 %vm517_vm10, %v1176_v55 }
 0x4ca   : > { %v1246_v54 = vpop.f32.mrf.mxu0 }
 0x4cb   : > { %1252 = vst.msk [vmem:[%s374_s18] sm:$0xff] %vm410_vm2, %v1246_v54 }
 0x4cc   : > { %v1435_v4 = vpop.f32.mrf.mxu0 }
 0x4cd   : > { %1620 = shalt.err (!%p1617_p9)
}
 0x4ce   : > { %s1621_s18 = scalar_lea.hbm %s2213_s25, 128  ;;  %s1625_s24 = scalar_lea.hbm %s2280_s10, 512 }
 0x4cf   : > { %p1622_p10 = scmp.ne.s32.totalorder %s2213_s25, %s1621_s18  ;;  %p1626_p13 = scmp.lt.s32.totalorder %s2213_s25, %s2280_s10 }
 0x4d0   : > { %p1627_p0 = scmp.lt.s32.totalorder %s1625_s24, %s1621_s18 }
 0x4d1   : > { %p1623_p11 = pnand %p1622_p10, %p1821_p3 }
 0x4d2   : > { %p1628_p1 = por %p1627_p0, %p1626_p13 }
 0x4d3   : > { %p1624_p12 = pneg %p1623_p11 }
 0x4d5   : > { %p1629_p2 = pnand %p1628_p1, %p1624_p12 }
 0x4d7   : > { %1632 = shalt.err (!%p1629_p2)
}
 0x4d8   : > { %1437 = dma.vmem_to_hbm [thread:$0]  (%p1821_p3), %s2215_s11, 128, %s2213_s25, %s1254_s16   ;;  %v1249_v16 = vpop.f32.mrf.mxu0 }
 0x4da   : > { %v1436_v18 = vpop.f32.mrf.mxu0 }
 0x4db PF: > { %p1443_p4 = scmp.ge.s32.totalorder %s1699_s20, 2  ;;  %s1281_s17 = sand.u32 1, %s1671_s13  }
 0x4dc   : > { %s1282_s28 = scalar_lea.sflag [#allocation9], %s1281_s17 }
 0x4dd   : > { %p1440_p5 = pnand %p1443_p4, %p1830_p8 }
 0x4df   : > { %p1441_p6 = pneg %p1440_p5 }
 0x4e1   : > { %1666 = dma.done.wait (%p1441_p6), %s1282_s28, 128  }
 0x4e2   : > { %1668 = vsyncadd (%p1441_p6), %s1282_s28, 4294967168  ;;  %s23_s20 = sadd.s32 1, %s1699_s20   ;;  %s2294_s26 = sld [smem:[#allocation15_spill]] }
 0x4e3   : > { %p20_p7 = scmp.ge.s32.totalorder %s23_s20, 6   ;;  %s2295_s16 = sld [smem:[#allocation11_spill]] }
 0x4e4   : > { %s2296_s17 = sld [smem:[#allocation12_spill]]  ;;  %s2299_s13 = smov %s1675_s14 }
 0x4e5   : > { %s2297_s18 = sld [smem:[#allocation13_spill]]  ;;  %s2300_s14 = smov %s1679_s15 }
 0x4e6   : > { %s2298_s19 = sld [smem:[#allocation14_spill]]  ;;  %22 = sbr.rel (!%p20_p7) target bundleno = 5 (0x5), region = 99 }
 0x4e8   : > { %s2301_s15 = smov %s2294_s26 }
 0x4eb   :  { %1287 = vsyncpa [#allocation9], 1 }
 0x4ec   :  { %1289 = vsyncpa [#allocation9 + $0x1], 1 }

</bundles_post_ra>
